<compile_context>
chip_gen: v7x
topology: tpu7x:2x2x1
jax: 0.10.0
libtpu: 0.0.40
codegen_flags: <defaults>
</compile_context>

<pallas_src>
import functools
import math

import jax
import jax.numpy as jnp
from jax.experimental import pallas as pl
from jax.experimental.pallas import tpu as pltpu


def _layernorm(v, g, b, eps):
    mu = jnp.mean(v, axis=-1, keepdims=True)
    d = v - mu
    var = jnp.mean(d * d, axis=-1, keepdims=True)
    return d * jax.lax.rsqrt(var + eps) * g + b


def _decoder_layer_kernel(x_ref, mask_ref,
                          ln1_g_ref, ln1_b_ref,
                          wqkv_ref, bqkv_ref,
                          wo_ref, bo_ref,
                          ln2_g_ref, ln2_b_ref,
                          w1_ref, b1_ref, w2_ref, b2_ref,
                          o_ref,
                          cat_ref,
                          *, num_heads: int, head_dim: int, ln_eps: float):
    Bt, S, E = x_ref.shape
    R = Bt * S
    D = head_dim

    x = x_ref[...].astype(jnp.float32).reshape(R, E)          # rows = Bt*S

    # ---------------- LayerNorm 1 (f32) ----------------
    xn1 = _layernorm(x, ln1_g_ref[...], ln1_b_ref[...], ln_eps)

    # -------- fused QKV projection: one lane-dense MXU matmul (f32 acc) --------
    qkv = jnp.dot(xn1.astype(jnp.bfloat16), wqkv_ref[...],
                  preferred_element_type=jnp.float32) + bqkv_ref[...]   # (R, 3E)
    # Heads are packed head-major along lanes; 1/sqrt(D) already folded into
    # the q columns of wqkv/bqkv in the wrapper.
    q = qkv[:, :E].astype(jnp.bfloat16).reshape(Bt, S, E)
    k = qkv[:, E:2 * E].astype(jnp.bfloat16).reshape(Bt, S, E)
    v = qkv[:, 2 * E:].astype(jnp.bfloat16).reshape(Bt, S, E)

    # Additive mask bias, hoisted out of the head loop and materialized once.
    # (A fully-masked row degenerates to a uniform softmax, same as the
    #  reference's masked_fill(-1e9) behavior.)
    mask = mask_ref[...]                                       # (Bt, 1, S) f32
    neg_bias = jnp.where(mask == 0.0, jnp.float32(-1e9), jnp.float32(0.0))
    neg_bias = jnp.broadcast_to(neg_bias, (Bt, S, S))

    # ---- per-head attention; outputs land in a bf16 VMEM slab at lane h*D ----
    # H is small & static here; at realistic H convert to lax.fori_loop or a
    # grid axis so vreg live ranges stay bounded.
    for h in range(num_heads):
        sl = slice(h * D, (h + 1) * D)
        scores = jnp.einsum("bqd,bkd->bqk", q[:, :, sl], k[:, :, sl],
                            preferred_element_type=jnp.float32)        # (Bt,S,S)
        scores = scores + neg_bias
        scores = scores - jnp.max(scores, axis=-1, keepdims=True)
        p = jnp.exp(scores)
        denom = jnp.sum(p, axis=-1, keepdims=True)
        # approx reciprocal (EUP slot); fine at this tolerance, use approx=False
        # or f32 P@V if reused for training.
        p = p * pl.reciprocal(denom, approx=True)
        attn_h = jnp.einsum("bqk,bkd->bqd", p.astype(jnp.bfloat16), v[:, :, sl],
                            preferred_element_type=jnp.float32)        # (Bt,S,D)
        cat_ref[:, :, sl] = attn_h.astype(jnp.bfloat16)

    # ---- single output projection: (R, H*D) @ (H*D, E), K = E ----
    attn_cat = cat_ref[...].reshape(R, E)                      # bf16
    attn_out = jnp.dot(attn_cat, wo_ref[...],
                       preferred_element_type=jnp.float32) + bo_ref[...]
    residual = x + attn_out                                    # first residual

    # ---------------- LayerNorm 2 + FeedForward ----------------
    xn2 = _layernorm(residual, ln2_g_ref[...], ln2_b_ref[...], ln_eps)
    h1 = jnp.dot(xn2.astype(jnp.bfloat16), w1_ref[...],
                 preferred_element_type=jnp.float32) + b1_ref[...]
    h1 = jnp.maximum(h1, 0.0)
    ff = jnp.dot(h1.astype(jnp.bfloat16), w2_ref[...],
                 preferred_element_type=jnp.float32) + b2_ref[...]

    o_ref[...] = (residual + ff).reshape(Bt, S, E).astype(o_ref.dtype)


def decoder_layer(x, mask, params, *, num_heads, block_b=None, ln_eps=1e-5):
    """x: (B, S, E) f32; mask: (B, S) with values {0, 1}."""
    B, S, E = x.shape
    H = num_heads
    D = E // H
    F = params["w1"].shape[1]
    bf16 = jnp.bfloat16

    if block_b is None:
        # Largest batch tile that divides B while keeping >= 2 grid steps
        # (both v7x TensorCores busy); larger tiles amortize per-step pipeline
        # overhead and enlarge the row dim of the fused matmuls.
        block_b = max(1, B // 2)
        while B % block_b:
            block_b -= 1
    assert B % block_b == 0

    # ---- wrapper-side weight packing (one-time XLA ops) ----
    scale = jnp.float32(1.0 / math.sqrt(D))

    def flat_w(w):   # (H, E, D) -> (E, H*D), head-major along lanes
        return jnp.transpose(w, (1, 0, 2)).reshape(E, H * D)

    def flat_b(b):   # (H, 1, D) -> (1, H*D), head-major
        return b.reshape(1, H * D)

    wqkv = jnp.concatenate(
        [flat_w(params["wq"]) * scale, flat_w(params["wk"]), flat_w(params["wv"])],
        axis=1).astype(bf16)                                    # (E, 3E)
    bqkv = jnp.concatenate(
        [flat_b(params["bq"]) * scale, flat_b(params["bk"]), flat_b(params["bv"])],
        axis=1).astype(jnp.float32)                             # (1, 3E)
    wo_flat = params["wo"].reshape(H * D, E).astype(bf16)       # (E, E)

    mask3 = mask.reshape(B, 1, S).astype(jnp.float32)

    kernel = functools.partial(_decoder_layer_kernel, num_heads=H,
                               head_dim=D, ln_eps=ln_eps)

    def build(single_buffer_weights):
        def const_spec(shape):
            ndim = len(shape)
            idx = lambda b: (0,) * ndim
            if single_buffer_weights:
                # Constant-index weights never change across grid steps;
                # single-buffer them so they are not double-allocated in VMEM.
                return pl.BlockSpec(shape, idx, pipeline_mode=pl.Buffered(1))
            return pl.BlockSpec(shape, idx)

        return pl.pallas_call(
            kernel,
            out_shape=jax.ShapeDtypeStruct((B, S, E), x.dtype),
            grid_spec=pltpu.PrefetchScalarGridSpec(
                num_scalar_prefetch=0,
                grid=(B // block_b,),
                in_specs=[
                    pl.BlockSpec((block_b, S, E), lambda b: (b, 0, 0)),   # x
                    pl.BlockSpec((block_b, 1, S), lambda b: (b, 0, 0)),   # mask
                    const_spec((1, E)), const_spec((1, E)),        # ln1 g/b
                    const_spec((E, 3 * E)), const_spec((1, 3 * E)),  # fused QKV
                    const_spec((E, E)), const_spec((1, E)),        # wo, bo
                    const_spec((1, E)), const_spec((1, E)),        # ln2 g/b
                    const_spec((E, F)), const_spec((1, F)),        # ffn linear1
                    const_spec((F, E)), const_spec((1, E)),        # ffn linear2
                ],
                out_specs=pl.BlockSpec((block_b, S, E), lambda b: (b, 0, 0)),
                scratch_shapes=[pltpu.VMEM((block_b, S, E), bf16)],  # head slab
            ),
            compiler_params=pltpu.CompilerParams(
                dimension_semantics=("parallel",),
                vmem_limit_bytes=48 * 1024 * 1024),   # fits v7x's 64 MiB VMEM
        )

    args = (x, mask3,
            params["ln1_g"], params["ln1_b"],
            wqkv, bqkv,
            wo_flat, params["bo"],
            params["ln2_g"], params["ln2_b"],
            params["w1"].astype(bf16), params["b1"],
            params["w2"].astype(bf16), params["b2"])

    try:
        return build(True)(*args)
    except Exception:
        # Fallback for jax versions where BlockSpec.pipeline_mode /
        # pl.Buffered(1) is not supported by the TPU pallas lowering.
        return build(False)(*args)


def init_params(key, embed_dim, num_heads, ff_dim):
    """Deterministic params. Per-head Q/K/V (and O) weights are stored with a
    leading head axis, already transposed to (in, out)."""
    D = embed_dim // num_heads
    H = num_heads
    ks = jax.random.split(key, 16)
    s_e = 1.0 / math.sqrt(embed_dim)
    s_hd = 1.0 / math.sqrt(H * D)
    s_ff = 1.0 / math.sqrt(ff_dim)

    def u(k, shape, s):
        return jax.random.uniform(k, shape, jnp.float32, -s, s)

    return {
        "wq": u(ks[0], (H, embed_dim, D), s_e),
        "bq": u(ks[1], (H, 1, D), s_e),
        "wk": u(ks[2], (H, embed_dim, D), s_e),
        "bk": u(ks[3], (H, 1, D), s_e),
        "wv": u(ks[4], (H, embed_dim, D), s_e),
        "bv": u(ks[5], (H, 1, D), s_e),
        "wo": u(ks[6], (H, D, embed_dim), s_hd),
        "bo": u(ks[7], (1, embed_dim), s_hd),
        "w1": u(ks[8], (embed_dim, ff_dim), s_e),
        "b1": u(ks[9], (1, ff_dim), s_e),
        "w2": u(ks[10], (ff_dim, embed_dim), s_ff),
        "b2": u(ks[11], (1, embed_dim), s_ff),
        "ln1_g": 1.0 + 0.1 * jax.random.normal(ks[12], (1, embed_dim), jnp.float32),
        "ln1_b": 0.1 * jax.random.normal(ks[13], (1, embed_dim), jnp.float32),
        "ln2_g": 1.0 + 0.1 * jax.random.normal(ks[14], (1, embed_dim), jnp.float32),
        "ln2_b": 0.1 * jax.random.normal(ks[15], (1, embed_dim), jnp.float32),
    }


def _reference(x, mask, params, num_heads, eps=1e-5):
    """Pure-JAX f32 reference mirroring the PyTorch DecoderLayer.forward (eval)."""
    B, S, E = x.shape
    D = E // num_heads

    def ln(v, g, b):
        mu = v.mean(-1, keepdims=True)
        var = ((v - mu) ** 2).mean(-1, keepdims=True)
        return (v - mu) / jnp.sqrt(var + eps) * g + b

    xn1 = ln(x, params["ln1_g"], params["ln1_b"])
    m = mask.reshape(B, 1, S)
    outs = []
    for h in range(num_heads):
        q = xn1 @ params["wq"][h] + params["bq"][h]
        k = xn1 @ params["wk"][h] + params["bk"][h]
        v = xn1 @ params["wv"][h] + params["bv"][h]
        w = jnp.einsum("bqd,bkd->bqk", q, k) / math.sqrt(D)
        w = jnp.where(m == 0, -1.0e9, w)
        w = jax.nn.softmax(w, axis=-1)
        outs.append(jnp.einsum("bqk,bkd->bqd", w, v))
    cat = jnp.concatenate(outs, axis=-1)
    attn = cat @ params["wo"].reshape(num_heads * D, E) + params["bo"]

    residual = x + attn
    xn2 = ln(residual, params["ln2_g"], params["ln2_b"])
    hdn = jax.nn.relu(xn2 @ params["w1"] + params["b1"])
    ff = hdn @ params["w2"] + params["b2"]
    return residual + ff


if __name__ == "__main__":
    key = jax.random.PRNGKey(0)
    B, S, E, H, F = 2, 8, 32, 4, 64

    k_x, k_m, k_p = jax.random.split(key, 3)
    x = jax.random.normal(k_x, (B, S, E), jnp.float32)
    # mask: 0/1, keep at least the first token unmasked per batch element
    mask = (jax.random.uniform(k_m, (B, S)) > 0.3).astype(jnp.float32)
    mask = mask.at[:, 0].set(1.0)

    params = init_params(k_p, E, H, F)

    out = decoder_layer(x, mask, params, num_heads=H)
    out = jax.block_until_ready(out)

    ref = _reference(x, mask, params, H)
    assert out.shape == (B, S, E)
    max_err = float(jnp.max(jnp.abs(out - ref)))
    # bf16 MXU inputs (f32 accumulation) + approx reciprocal => looser tolerance
    # than a pure-f32 comparison.
    assert jnp.allclose(out, ref, atol=5e-2, rtol=5e-2), max_err

    print("KERNEL_OK")
</pallas_src>

<mosaic_0001>
module attributes {stable_mosaic.version = 11 : i64} {
  func.func @_decoder_layer_kernel(%arg0: i32, %arg1: memref<1x8x32xf32, #tpu.memory_space<vmem>>, %arg2: memref<1x1x8xf32, #tpu.memory_space<vmem>>, %arg3: memref<1x32xf32, #tpu.memory_space<vmem>>, %arg4: memref<1x32xf32, #tpu.memory_space<vmem>>, %arg5: memref<32x96xbf16, #tpu.memory_space<vmem>>, %arg6: memref<1x96xf32, #tpu.memory_space<vmem>>, %arg7: memref<32x32xbf16, #tpu.memory_space<vmem>>, %arg8: memref<1x32xf32, #tpu.memory_space<vmem>>, %arg9: memref<1x32xf32, #tpu.memory_space<vmem>>, %arg10: memref<1x32xf32, #tpu.memory_space<vmem>>, %arg11: memref<32x64xbf16, #tpu.memory_space<vmem>>, %arg12: memref<1x64xf32, #tpu.memory_space<vmem>>, %arg13: memref<64x32xbf16, #tpu.memory_space<vmem>>, %arg14: memref<1x32xf32, #tpu.memory_space<vmem>>, %arg15: memref<1x8x32xf32, #tpu.memory_space<vmem>>, %arg16: memref<1x8x32xbf16, #tpu.memory_space<vmem>>) attributes {dimension_semantics = [#tpu.dimension_semantics<parallel>], iteration_bounds = array<i64: 2>, scalar_prefetch = 0 : i64, scratch_operands = 1 : i64, tpu.core_type = #tpu.core_type<tc>, window_params = [{transform_indices = @transform_0, window_bounds = array<i64: 1, 8, 32>}, {transform_indices = @transform_1, window_bounds = array<i64: 1, 1, 8>}, {pipeline_mode = #tpu.pipeline_mode<synchronous>, transform_indices = @transform_2, window_bounds = array<i64: 1, 32>}, {pipeline_mode = #tpu.pipeline_mode<synchronous>, transform_indices = @transform_3, window_bounds = array<i64: 1, 32>}, {pipeline_mode = #tpu.pipeline_mode<synchronous>, transform_indices = @transform_4, window_bounds = array<i64: 32, 96>}, {pipeline_mode = #tpu.pipeline_mode<synchronous>, transform_indices = @transform_5, window_bounds = array<i64: 1, 96>}, {pipeline_mode = #tpu.pipeline_mode<synchronous>, transform_indices = @transform_6, window_bounds = array<i64: 32, 32>}, {pipeline_mode = #tpu.pipeline_mode<synchronous>, transform_indices = @transform_7, window_bounds = array<i64: 1, 32>}, {pipeline_mode = #tpu.pipeline_mode<synchronous>, transform_indices = @transform_8, window_bounds = array<i64: 1, 32>}, {pipeline_mode = #tpu.pipeline_mode<synchronous>, transform_indices = @transform_9, window_bounds = array<i64: 1, 32>}, {pipeline_mode = #tpu.pipeline_mode<synchronous>, transform_indices = @transform_10, window_bounds = array<i64: 32, 64>}, {pipeline_mode = #tpu.pipeline_mode<synchronous>, transform_indices = @transform_11, window_bounds = array<i64: 1, 64>}, {pipeline_mode = #tpu.pipeline_mode<synchronous>, transform_indices = @transform_12, window_bounds = array<i64: 64, 32>}, {pipeline_mode = #tpu.pipeline_mode<synchronous>, transform_indices = @transform_13, window_bounds = array<i64: 1, 32>}, {transform_indices = @transform_14, window_bounds = array<i64: 1, 8, 32>}]} {
    %c0 = arith.constant 0 : index
    %c0_0 = arith.constant 0 : index
    %c0_1 = arith.constant 0 : index
    %0 = vector.load %arg1[%c0, %c0_0, %c0_1] : memref<1x8x32xf32, #tpu.memory_space<vmem>>, vector<1x8x32xf32>
    %1 = vector.shape_cast %0 : vector<1x8x32xf32> to vector<8x32xf32>
    %c0_2 = arith.constant 0 : index
    %c0_3 = arith.constant 0 : index
    %2 = vector.load %arg3[%c0_2, %c0_3] : memref<1x32xf32, #tpu.memory_space<vmem>>, vector<1x32xf32>
    %c0_4 = arith.constant 0 : index
    %c0_5 = arith.constant 0 : index
    %3 = vector.load %arg4[%c0_4, %c0_5] : memref<1x32xf32, #tpu.memory_space<vmem>>, vector<1x32xf32>
    %cst = arith.constant dense<0.000000e+00> : vector<8xf32>
    %4 = vector.multi_reduction <add>, %1, %cst [1] : vector<8x32xf32> to vector<8xf32>
    %5 = vector.shape_cast %4 : vector<8xf32> to vector<8x1xf32>
    %cst_6 = arith.constant 3.200000e+01 : f32
    %6 = vector.broadcast %cst_6 : f32 to vector<8x1xf32>
    %7 = arith.divf %5, %6 : vector<8x1xf32>
    %8 = vector.broadcast %7 : vector<8x1xf32> to vector<8x32xf32>
    %9 = arith.subf %1, %8 : vector<8x32xf32>
    %10 = arith.mulf %9, %9 : vector<8x32xf32>
    %cst_7 = arith.constant dense<0.000000e+00> : vector<8xf32>
    %11 = vector.multi_reduction <add>, %10, %cst_7 [1] : vector<8x32xf32> to vector<8xf32>
    %12 = vector.shape_cast %11 : vector<8xf32> to vector<8x1xf32>
    %cst_8 = arith.constant 3.200000e+01 : f32
    %13 = vector.broadcast %cst_8 : f32 to vector<8x1xf32>
    %14 = arith.divf %12, %13 : vector<8x1xf32>
    %cst_9 = arith.constant 9.99999974E-6 : f32
    %15 = vector.broadcast %cst_9 : f32 to vector<8x1xf32>
    %16 = arith.addf %14, %15 : vector<8x1xf32>
    %17 = math.rsqrt %16 : vector<8x1xf32>
    %18 = vector.broadcast %17 : vector<8x1xf32> to vector<8x32xf32>
    %19 = arith.mulf %9, %18 : vector<8x32xf32>
    %20 = vector.broadcast %2 : vector<1x32xf32> to vector<8x32xf32>
    %21 = arith.mulf %19, %20 : vector<8x32xf32>
    %22 = vector.broadcast %3 : vector<1x32xf32> to vector<8x32xf32>
    %23 = arith.addf %21, %22 : vector<8x32xf32>
    %24 = arith.truncf %23 : vector<8x32xf32> to vector<8x32xbf16>
    %c0_10 = arith.constant 0 : index
    %c0_11 = arith.constant 0 : index
    %25 = vector.load %arg5[%c0_10, %c0_11] : memref<32x96xbf16, #tpu.memory_space<vmem>>, vector<32x96xbf16>
    %cst_12 = arith.constant dense<0.000000e+00> : vector<8x96xf32>
    %26 = tpu.matmul %24, %25, %cst_12 {dimension_numbers = #tpu.dot_dimension_numbers<[1], [0], [0], [1], [0, 0, 1, 1], [], []>} : vector<8x32xbf16>, vector<32x96xbf16>, vector<8x96xf32> -> vector<8x96xf32>
    %c0_13 = arith.constant 0 : index
    %c0_14 = arith.constant 0 : index
    %27 = vector.load %arg6[%c0_13, %c0_14] : memref<1x96xf32, #tpu.memory_space<vmem>>, vector<1x96xf32>
    %28 = vector.broadcast %27 : vector<1x96xf32> to vector<8x96xf32>
    %29 = arith.addf %26, %28 : vector<8x96xf32>
    %30 = vector.extract_strided_slice %29 {offsets = [0, 0], sizes = [8, 32], strides = [1, 1]} : vector<8x96xf32> to vector<8x32xf32>
    %31 = arith.truncf %30 : vector<8x32xf32> to vector<8x32xbf16>
    %32 = vector.shape_cast %31 : vector<8x32xbf16> to vector<1x8x32xbf16>
    %33 = vector.extract_strided_slice %29 {offsets = [0, 32], sizes = [8, 32], strides = [1, 1]} : vector<8x96xf32> to vector<8x32xf32>
    %34 = arith.truncf %33 : vector<8x32xf32> to vector<8x32xbf16>
    %35 = vector.shape_cast %34 : vector<8x32xbf16> to vector<1x8x32xbf16>
    %36 = vector.extract_strided_slice %29 {offsets = [0, 64], sizes = [8, 32], strides = [1, 1]} : vector<8x96xf32> to vector<8x32xf32>
    %37 = arith.truncf %36 : vector<8x32xf32> to vector<8x32xbf16>
    %38 = vector.shape_cast %37 : vector<8x32xbf16> to vector<1x8x32xbf16>
    %c0_15 = arith.constant 0 : index
    %c0_16 = arith.constant 0 : index
    %c0_17 = arith.constant 0 : index
    %39 = vector.load %arg2[%c0_15, %c0_16, %c0_17] : memref<1x1x8xf32, #tpu.memory_space<vmem>>, vector<1x1x8xf32>
    %cst_18 = arith.constant 0.000000e+00 : f32
    %40 = vector.broadcast %cst_18 : f32 to vector<1x1x8xf32>
    %41 = arith.cmpf oeq, %39, %40 : vector<1x1x8xf32>
    %cst_19 = arith.constant -1.000000e+09 : f32
    %cst_20 = arith.constant 0.000000e+00 : f32
    %42 = vector.broadcast %cst_19 : f32 to vector<1x1x8xf32>
    %43 = vector.broadcast %cst_20 : f32 to vector<1x1x8xf32>
    %44 = arith.select %41, %42, %43 : vector<1x1x8xi1>, vector<1x1x8xf32>
    %45 = vector.shape_cast %44 : vector<1x1x8xf32> to vector<1x1x8xf32>
    %46 = vector.broadcast %45 : vector<1x1x8xf32> to vector<1x8x8xf32>
    %47 = vector.extract_strided_slice %32 {offsets = [0, 0, 0], sizes = [1, 8, 8], strides = [1, 1, 1]} : vector<1x8x32xbf16> to vector<1x8x8xbf16>
    %48 = vector.extract_strided_slice %35 {offsets = [0, 0, 0], sizes = [1, 8, 8], strides = [1, 1, 1]} : vector<1x8x32xbf16> to vector<1x8x8xbf16>
    "tpu.trace_start"() <{level = 10 : i32, message = "bqd,bkd->bqk"}> : () -> ()
    %cst_21 = arith.constant dense<0.000000e+00> : vector<1x8x8xf32>
    %49 = tpu.matmul %47, %48, %cst_21 {dimension_numbers = #tpu.dot_dimension_numbers<[2], [2], [1], [1], [0, 0, 0, 1, 1, 1], [0], [0]>} : vector<1x8x8xbf16>, vector<1x8x8xbf16>, vector<1x8x8xf32> -> vector<1x8x8xf32>
    "tpu.trace_stop"() : () -> ()
    %50 = arith.addf %49, %46 : vector<1x8x8xf32>
    %cst_22 = arith.constant dense<0xFF800000> : vector<1x8xf32>
    %51 = vector.multi_reduction <maximumf>, %50, %cst_22 [2] : vector<1x8x8xf32> to vector<1x8xf32>
    %52 = vector.shape_cast %51 : vector<1x8xf32> to vector<1x8x1xf32>
    %53 = vector.broadcast %52 : vector<1x8x1xf32> to vector<1x8x8xf32>
    %54 = arith.subf %50, %53 : vector<1x8x8xf32>
    %55 = math.exp %54 : vector<1x8x8xf32>
    %cst_23 = arith.constant dense<0.000000e+00> : vector<1x8xf32>
    %56 = vector.multi_reduction <add>, %55, %cst_23 [2] : vector<1x8x8xf32> to vector<1x8xf32>
    %57 = vector.shape_cast %56 : vector<1x8xf32> to vector<1x8x1xf32>
    %58 = tpu.reciprocal %57 {approx = true} : vector<1x8x1xf32> -> vector<1x8x1xf32>
    %59 = vector.broadcast %58 : vector<1x8x1xf32> to vector<1x8x8xf32>
    %60 = arith.mulf %55, %59 : vector<1x8x8xf32>
    %61 = arith.truncf %60 : vector<1x8x8xf32> to vector<1x8x8xbf16>
    %62 = vector.extract_strided_slice %38 {offsets = [0, 0, 0], sizes = [1, 8, 8], strides = [1, 1, 1]} : vector<1x8x32xbf16> to vector<1x8x8xbf16>
    "tpu.trace_start"() <{level = 10 : i32, message = "bqk,bkd->bqd"}> : () -> ()
    %cst_24 = arith.constant dense<0.000000e+00> : vector<1x8x8xf32>
    %63 = tpu.matmul %61, %62, %cst_24 {dimension_numbers = #tpu.dot_dimension_numbers<[2], [1], [1], [2], [0, 0, 0, 1, 1, 2], [0], [0]>} : vector<1x8x8xbf16>, vector<1x8x8xbf16>, vector<1x8x8xf32> -> vector<1x8x8xf32>
    "tpu.trace_stop"() : () -> ()
    %64 = arith.truncf %63 : vector<1x8x8xf32> to vector<1x8x8xbf16>
    %c0_25 = arith.constant 0 : index
    %c0_26 = arith.constant 0 : index
    %c0_27 = arith.constant 0 : index
    %65 = vector.load %arg16[%c0_25, %c0_26, %c0_27] : memref<1x8x32xbf16, #tpu.memory_space<vmem>>, vector<1x8x8xbf16>
    tpu.vector_store %arg16[%c0_25, %c0_26, %c0_27], %64 {strides = array<i32>} : memref<1x8x32xbf16, #tpu.memory_space<vmem>>, vector<1x8x8xbf16>,
    %66 = vector.extract_strided_slice %32 {offsets = [0, 0, 8], sizes = [1, 8, 8], strides = [1, 1, 1]} : vector<1x8x32xbf16> to vector<1x8x8xbf16>
    %67 = vector.extract_strided_slice %35 {offsets = [0, 0, 8], sizes = [1, 8, 8], strides = [1, 1, 1]} : vector<1x8x32xbf16> to vector<1x8x8xbf16>
    "tpu.trace_start"() <{level = 10 : i32, message = "bqd,bkd->bqk"}> : () -> ()
    %cst_28 = arith.constant dense<0.000000e+00> : vector<1x8x8xf32>
    %68 = tpu.matmul %66, %67, %cst_28 {dimension_numbers = #tpu.dot_dimension_numbers<[2], [2], [1], [1], [0, 0, 0, 1, 1, 1], [0], [0]>} : vector<1x8x8xbf16>, vector<1x8x8xbf16>, vector<1x8x8xf32> -> vector<1x8x8xf32>
    "tpu.trace_stop"() : () -> ()
    %69 = arith.addf %68, %46 : vector<1x8x8xf32>
    %cst_29 = arith.constant dense<0xFF800000> : vector<1x8xf32>
    %70 = vector.multi_reduction <maximumf>, %69, %cst_29 [2] : vector<1x8x8xf32> to vector<1x8xf32>
    %71 = vector.shape_cast %70 : vector<1x8xf32> to vector<1x8x1xf32>
    %72 = vector.broadcast %71 : vector<1x8x1xf32> to vector<1x8x8xf32>
    %73 = arith.subf %69, %72 : vector<1x8x8xf32>
    %74 = math.exp %73 : vector<1x8x8xf32>
    %cst_30 = arith.constant dense<0.000000e+00> : vector<1x8xf32>
    %75 = vector.multi_reduction <add>, %74, %cst_30 [2] : vector<1x8x8xf32> to vector<1x8xf32>
    %76 = vector.shape_cast %75 : vector<1x8xf32> to vector<1x8x1xf32>
    %77 = tpu.reciprocal %76 {approx = true} : vector<1x8x1xf32> -> vector<1x8x1xf32>
    %78 = vector.broadcast %77 : vector<1x8x1xf32> to vector<1x8x8xf32>
    %79 = arith.mulf %74, %78 : vector<1x8x8xf32>
    %80 = arith.truncf %79 : vector<1x8x8xf32> to vector<1x8x8xbf16>
    %81 = vector.extract_strided_slice %38 {offsets = [0, 0, 8], sizes = [1, 8, 8], strides = [1, 1, 1]} : vector<1x8x32xbf16> to vector<1x8x8xbf16>
    "tpu.trace_start"() <{level = 10 : i32, message = "bqk,bkd->bqd"}> : () -> ()
    %cst_31 = arith.constant dense<0.000000e+00> : vector<1x8x8xf32>
    %82 = tpu.matmul %80, %81, %cst_31 {dimension_numbers = #tpu.dot_dimension_numbers<[2], [1], [1], [2], [0, 0, 0, 1, 1, 2], [0], [0]>} : vector<1x8x8xbf16>, vector<1x8x8xbf16>, vector<1x8x8xf32> -> vector<1x8x8xf32>
    "tpu.trace_stop"() : () -> ()
    %83 = arith.truncf %82 : vector<1x8x8xf32> to vector<1x8x8xbf16>
    %c0_32 = arith.constant 0 : index
    %c0_33 = arith.constant 0 : index
    %c8 = arith.constant 8 : index
    %84 = vector.load %arg16[%c0_32, %c0_33, %c8] : memref<1x8x32xbf16, #tpu.memory_space<vmem>>, vector<1x8x8xbf16>
    tpu.vector_store %arg16[%c0_32, %c0_33, %c8], %83 {strides = array<i32>} : memref<1x8x32xbf16, #tpu.memory_space<vmem>>, vector<1x8x8xbf16>,
    %85 = vector.extract_strided_slice %32 {offsets = [0, 0, 16], sizes = [1, 8, 8], strides = [1, 1, 1]} : vector<1x8x32xbf16> to vector<1x8x8xbf16>
    %86 = vector.extract_strided_slice %35 {offsets = [0, 0, 16], sizes = [1, 8, 8], strides = [1, 1, 1]} : vector<1x8x32xbf16> to vector<1x8x8xbf16>
    "tpu.trace_start"() <{level = 10 : i32, message = "bqd,bkd->bqk"}> : () -> ()
    %cst_34 = arith.constant dense<0.000000e+00> : vector<1x8x8xf32>
    %87 = tpu.matmul %85, %86, %cst_34 {dimension_numbers = #tpu.dot_dimension_numbers<[2], [2], [1], [1], [0, 0, 0, 1, 1, 1], [0], [0]>} : vector<1x8x8xbf16>, vector<1x8x8xbf16>, vector<1x8x8xf32> -> vector<1x8x8xf32>
    "tpu.trace_stop"() : () -> ()
    %88 = arith.addf %87, %46 : vector<1x8x8xf32>
    %cst_35 = arith.constant dense<0xFF800000> : vector<1x8xf32>
    %89 = vector.multi_reduction <maximumf>, %88, %cst_35 [2] : vector<1x8x8xf32> to vector<1x8xf32>
    %90 = vector.shape_cast %89 : vector<1x8xf32> to vector<1x8x1xf32>
    %91 = vector.broadcast %90 : vector<1x8x1xf32> to vector<1x8x8xf32>
    %92 = arith.subf %88, %91 : vector<1x8x8xf32>
    %93 = math.exp %92 : vector<1x8x8xf32>
    %cst_36 = arith.constant dense<0.000000e+00> : vector<1x8xf32>
    %94 = vector.multi_reduction <add>, %93, %cst_36 [2] : vector<1x8x8xf32> to vector<1x8xf32>
    %95 = vector.shape_cast %94 : vector<1x8xf32> to vector<1x8x1xf32>
    %96 = tpu.reciprocal %95 {approx = true} : vector<1x8x1xf32> -> vector<1x8x1xf32>
    %97 = vector.broadcast %96 : vector<1x8x1xf32> to vector<1x8x8xf32>
    %98 = arith.mulf %93, %97 : vector<1x8x8xf32>
    %99 = arith.truncf %98 : vector<1x8x8xf32> to vector<1x8x8xbf16>
    %100 = vector.extract_strided_slice %38 {offsets = [0, 0, 16], sizes = [1, 8, 8], strides = [1, 1, 1]} : vector<1x8x32xbf16> to vector<1x8x8xbf16>
    "tpu.trace_start"() <{level = 10 : i32, message = "bqk,bkd->bqd"}> : () -> ()
    %cst_37 = arith.constant dense<0.000000e+00> : vector<1x8x8xf32>
    %101 = tpu.matmul %99, %100, %cst_37 {dimension_numbers = #tpu.dot_dimension_numbers<[2], [1], [1], [2], [0, 0, 0, 1, 1, 2], [0], [0]>} : vector<1x8x8xbf16>, vector<1x8x8xbf16>, vector<1x8x8xf32> -> vector<1x8x8xf32>
    "tpu.trace_stop"() : () -> ()
    %102 = arith.truncf %101 : vector<1x8x8xf32> to vector<1x8x8xbf16>
    %c0_38 = arith.constant 0 : index
    %c0_39 = arith.constant 0 : index
    %c16 = arith.constant 16 : index
    %103 = vector.load %arg16[%c0_38, %c0_39, %c16] : memref<1x8x32xbf16, #tpu.memory_space<vmem>>, vector<1x8x8xbf16>
    tpu.vector_store %arg16[%c0_38, %c0_39, %c16], %102 {strides = array<i32>} : memref<1x8x32xbf16, #tpu.memory_space<vmem>>, vector<1x8x8xbf16>,
    %104 = vector.extract_strided_slice %32 {offsets = [0, 0, 24], sizes = [1, 8, 8], strides = [1, 1, 1]} : vector<1x8x32xbf16> to vector<1x8x8xbf16>
    %105 = vector.extract_strided_slice %35 {offsets = [0, 0, 24], sizes = [1, 8, 8], strides = [1, 1, 1]} : vector<1x8x32xbf16> to vector<1x8x8xbf16>
    "tpu.trace_start"() <{level = 10 : i32, message = "bqd,bkd->bqk"}> : () -> ()
    %cst_40 = arith.constant dense<0.000000e+00> : vector<1x8x8xf32>
    %106 = tpu.matmul %104, %105, %cst_40 {dimension_numbers = #tpu.dot_dimension_numbers<[2], [2], [1], [1], [0, 0, 0, 1, 1, 1], [0], [0]>} : vector<1x8x8xbf16>, vector<1x8x8xbf16>, vector<1x8x8xf32> -> vector<1x8x8xf32>
    "tpu.trace_stop"() : () -> ()
    %107 = arith.addf %106, %46 : vector<1x8x8xf32>
    %cst_41 = arith.constant dense<0xFF800000> : vector<1x8xf32>
    %108 = vector.multi_reduction <maximumf>, %107, %cst_41 [2] : vector<1x8x8xf32> to vector<1x8xf32>
    %109 = vector.shape_cast %108 : vector<1x8xf32> to vector<1x8x1xf32>
    %110 = vector.broadcast %109 : vector<1x8x1xf32> to vector<1x8x8xf32>
    %111 = arith.subf %107, %110 : vector<1x8x8xf32>
    %112 = math.exp %111 : vector<1x8x8xf32>
    %cst_42 = arith.constant dense<0.000000e+00> : vector<1x8xf32>
    %113 = vector.multi_reduction <add>, %112, %cst_42 [2] : vector<1x8x8xf32> to vector<1x8xf32>
    %114 = vector.shape_cast %113 : vector<1x8xf32> to vector<1x8x1xf32>
    %115 = tpu.reciprocal %114 {approx = true} : vector<1x8x1xf32> -> vector<1x8x1xf32>
    %116 = vector.broadcast %115 : vector<1x8x1xf32> to vector<1x8x8xf32>
    %117 = arith.mulf %112, %116 : vector<1x8x8xf32>
    %118 = arith.truncf %117 : vector<1x8x8xf32> to vector<1x8x8xbf16>
    %119 = vector.extract_strided_slice %38 {offsets = [0, 0, 24], sizes = [1, 8, 8], strides = [1, 1, 1]} : vector<1x8x32xbf16> to vector<1x8x8xbf16>
    "tpu.trace_start"() <{level = 10 : i32, message = "bqk,bkd->bqd"}> : () -> ()
    %cst_43 = arith.constant dense<0.000000e+00> : vector<1x8x8xf32>
    %120 = tpu.matmul %118, %119, %cst_43 {dimension_numbers = #tpu.dot_dimension_numbers<[2], [1], [1], [2], [0, 0, 0, 1, 1, 2], [0], [0]>} : vector<1x8x8xbf16>, vector<1x8x8xbf16>, vector<1x8x8xf32> -> vector<1x8x8xf32>
    "tpu.trace_stop"() : () -> ()
    %121 = arith.truncf %120 : vector<1x8x8xf32> to vector<1x8x8xbf16>
    %c0_44 = arith.constant 0 : index
    %c0_45 = arith.constant 0 : index
    %c24 = arith.constant 24 : index
    %122 = vector.load %arg16[%c0_44, %c0_45, %c24] : memref<1x8x32xbf16, #tpu.memory_space<vmem>>, vector<1x8x8xbf16>
    tpu.vector_store %arg16[%c0_44, %c0_45, %c24], %121 {strides = array<i32>} : memref<1x8x32xbf16, #tpu.memory_space<vmem>>, vector<1x8x8xbf16>,
    %c0_46 = arith.constant 0 : index
    %c0_47 = arith.constant 0 : index
    %c0_48 = arith.constant 0 : index
    %123 = vector.load %arg16[%c0_46, %c0_47, %c0_48] : memref<1x8x32xbf16, #tpu.memory_space<vmem>>, vector<1x8x32xbf16>
    %124 = vector.shape_cast %123 : vector<1x8x32xbf16> to vector<8x32xbf16>
    %c0_49 = arith.constant 0 : index
    %c0_50 = arith.constant 0 : index
    %125 = vector.load %arg7[%c0_49, %c0_50] : memref<32x32xbf16, #tpu.memory_space<vmem>>, vector<32x32xbf16>
    %cst_51 = arith.constant dense<0.000000e+00> : vector<8x32xf32>
    %126 = tpu.matmul %124, %125, %cst_51 {dimension_numbers = #tpu.dot_dimension_numbers<[1], [0], [0], [1], [0, 0, 1, 1], [], []>} : vector<8x32xbf16>, vector<32x32xbf16>, vector<8x32xf32> -> vector<8x32xf32>
    %c0_52 = arith.constant 0 : index
    %c0_53 = arith.constant 0 : index
    %127 = vector.load %arg8[%c0_52, %c0_53] : memref<1x32xf32, #tpu.memory_space<vmem>>, vector<1x32xf32>
    %128 = vector.broadcast %127 : vector<1x32xf32> to vector<8x32xf32>
    %129 = arith.addf %126, %128 : vector<8x32xf32>
    %130 = arith.addf %1, %129 : vector<8x32xf32>
    %c0_54 = arith.constant 0 : index
    %c0_55 = arith.constant 0 : index
    %131 = vector.load %arg9[%c0_54, %c0_55] : memref<1x32xf32, #tpu.memory_space<vmem>>, vector<1x32xf32>
    %c0_56 = arith.constant 0 : index
    %c0_57 = arith.constant 0 : index
    %132 = vector.load %arg10[%c0_56, %c0_57] : memref<1x32xf32, #tpu.memory_space<vmem>>, vector<1x32xf32>
    %cst_58 = arith.constant dense<0.000000e+00> : vector<8xf32>
    %133 = vector.multi_reduction <add>, %130, %cst_58 [1] : vector<8x32xf32> to vector<8xf32>
    %134 = vector.shape_cast %133 : vector<8xf32> to vector<8x1xf32>
    %cst_59 = arith.constant 3.200000e+01 : f32
    %135 = vector.broadcast %cst_59 : f32 to vector<8x1xf32>
    %136 = arith.divf %134, %135 : vector<8x1xf32>
    %137 = vector.broadcast %136 : vector<8x1xf32> to vector<8x32xf32>
    %138 = arith.subf %130, %137 : vector<8x32xf32>
    %139 = arith.mulf %138, %138 : vector<8x32xf32>
    %cst_60 = arith.constant dense<0.000000e+00> : vector<8xf32>
    %140 = vector.multi_reduction <add>, %139, %cst_60 [1] : vector<8x32xf32> to vector<8xf32>
    %141 = vector.shape_cast %140 : vector<8xf32> to vector<8x1xf32>
    %cst_61 = arith.constant 3.200000e+01 : f32
    %142 = vector.broadcast %cst_61 : f32 to vector<8x1xf32>
    %143 = arith.divf %141, %142 : vector<8x1xf32>
    %cst_62 = arith.constant 9.99999974E-6 : f32
    %144 = vector.broadcast %cst_62 : f32 to vector<8x1xf32>
    %145 = arith.addf %143, %144 : vector<8x1xf32>
    %146 = math.rsqrt %145 : vector<8x1xf32>
    %147 = vector.broadcast %146 : vector<8x1xf32> to vector<8x32xf32>
    %148 = arith.mulf %138, %147 : vector<8x32xf32>
    %149 = vector.broadcast %131 : vector<1x32xf32> to vector<8x32xf32>
    %150 = arith.mulf %148, %149 : vector<8x32xf32>
    %151 = vector.broadcast %132 : vector<1x32xf32> to vector<8x32xf32>
    %152 = arith.addf %150, %151 : vector<8x32xf32>
    %153 = arith.truncf %152 : vector<8x32xf32> to vector<8x32xbf16>
    %c0_63 = arith.constant 0 : index
    %c0_64 = arith.constant 0 : index
    %154 = vector.load %arg11[%c0_63, %c0_64] : memref<32x64xbf16, #tpu.memory_space<vmem>>, vector<32x64xbf16>
    %cst_65 = arith.constant dense<0.000000e+00> : vector<8x64xf32>
    %155 = tpu.matmul %153, %154, %cst_65 {dimension_numbers = #tpu.dot_dimension_numbers<[1], [0], [0], [1], [0, 0, 1, 1], [], []>} : vector<8x32xbf16>, vector<32x64xbf16>, vector<8x64xf32> -> vector<8x64xf32>
    %c0_66 = arith.constant 0 : index
    %c0_67 = arith.constant 0 : index
    %156 = vector.load %arg12[%c0_66, %c0_67] : memref<1x64xf32, #tpu.memory_space<vmem>>, vector<1x64xf32>
    %157 = vector.broadcast %156 : vector<1x64xf32> to vector<8x64xf32>
    %158 = arith.addf %155, %157 : vector<8x64xf32>
    %cst_68 = arith.constant 0.000000e+00 : f32
    %159 = vector.broadcast %cst_68 : f32 to vector<8x64xf32>
    %160 = arith.maximumf %158, %159 : vector<8x64xf32>
    %161 = arith.truncf %160 : vector<8x64xf32> to vector<8x64xbf16>
    %c0_69 = arith.constant 0 : index
    %c0_70 = arith.constant 0 : index
    %162 = vector.load %arg13[%c0_69, %c0_70] : memref<64x32xbf16, #tpu.memory_space<vmem>>, vector<64x32xbf16>
    %cst_71 = arith.constant dense<0.000000e+00> : vector<8x32xf32>
    %163 = tpu.matmul %161, %162, %cst_71 {dimension_numbers = #tpu.dot_dimension_numbers<[1], [0], [0], [1], [0, 0, 1, 1], [], []>} : vector<8x64xbf16>, vector<64x32xbf16>, vector<8x32xf32> -> vector<8x32xf32>
    %c0_72 = arith.constant 0 : index
    %c0_73 = arith.constant 0 : index
    %164 = vector.load %arg14[%c0_72, %c0_73] : memref<1x32xf32, #tpu.memory_space<vmem>>, vector<1x32xf32>
    %165 = vector.broadcast %164 : vector<1x32xf32> to vector<8x32xf32>
    %166 = arith.addf %163, %165 : vector<8x32xf32>
    %167 = arith.addf %130, %166 : vector<8x32xf32>
    %168 = vector.shape_cast %167 : vector<8x32xf32> to vector<1x8x32xf32>
    %c0_74 = arith.constant 0 : index
    %c0_75 = arith.constant 0 : index
    %c0_76 = arith.constant 0 : index
    %169 = vector.load %arg15[%c0_74, %c0_75, %c0_76] : memref<1x8x32xf32, #tpu.memory_space<vmem>>, vector<1x8x32xf32>
    tpu.vector_store %arg15[%c0_74, %c0_75, %c0_76], %168 {strides = array<i32>} : memref<1x8x32xf32, #tpu.memory_space<vmem>>, vector<1x8x32xf32>,
    return
  }
  func.func @transform_0(%arg0: i32) -> (i32, i32, i32) {
    %c0_i32 = arith.constant 0 : i32
    %c0_i32_0 = arith.constant 0 : i32
    %c0_i32_1 = arith.constant 0 : i32
    return %arg0, %c0_i32, %c0_i32_0 : i32, i32, i32
  }
  func.func @transform_1(%arg0: i32) -> (i32, i32, i32) {
    %c0_i32 = arith.constant 0 : i32
    %c0_i32_0 = arith.constant 0 : i32
    %c0_i32_1 = arith.constant 0 : i32
    return %arg0, %c0_i32, %c0_i32_0 : i32, i32, i32
  }
  func.func @transform_2(%arg0: i32) -> (i32, i32) {
    %c0_i32 = arith.constant 0 : i32
    %c0_i32_0 = arith.constant 0 : i32
    %c0_i32_1 = arith.constant 0 : i32
    return %c0_i32, %c0_i32_0 : i32, i32
  }
  func.func @transform_3(%arg0: i32) -> (i32, i32) {
    %c0_i32 = arith.constant 0 : i32
    %c0_i32_0 = arith.constant 0 : i32
    %c0_i32_1 = arith.constant 0 : i32
    return %c0_i32, %c0_i32_0 : i32, i32
  }
  func.func @transform_4(%arg0: i32) -> (i32, i32) {
    %c0_i32 = arith.constant 0 : i32
    %c0_i32_0 = arith.constant 0 : i32
    %c0_i32_1 = arith.constant 0 : i32
    return %c0_i32, %c0_i32_0 : i32, i32
  }
  func.func @transform_5(%arg0: i32) -> (i32, i32) {
    %c0_i32 = arith.constant 0 : i32
    %c0_i32_0 = arith.constant 0 : i32
    %c0_i32_1 = arith.constant 0 : i32
    return %c0_i32, %c0_i32_0 : i32, i32
  }
  func.func @transform_6(%arg0: i32) -> (i32, i32) {
    %c0_i32 = arith.constant 0 : i32
    %c0_i32_0 = arith.constant 0 : i32
    %c0_i32_1 = arith.constant 0 : i32
    return %c0_i32, %c0_i32_0 : i32, i32
  }
  func.func @transform_7(%arg0: i32) -> (i32, i32) {
    %c0_i32 = arith.constant 0 : i32
    %c0_i32_0 = arith.constant 0 : i32
    %c0_i32_1 = arith.constant 0 : i32
    return %c0_i32, %c0_i32_0 : i32, i32
  }
  func.func @transform_8(%arg0: i32) -> (i32, i32) {
    %c0_i32 = arith.constant 0 : i32
    %c0_i32_0 = arith.constant 0 : i32
    %c0_i32_1 = arith.constant 0 : i32
    return %c0_i32, %c0_i32_0 : i32, i32
  }
  func.func @transform_9(%arg0: i32) -> (i32, i32) {
    %c0_i32 = arith.constant 0 : i32
    %c0_i32_0 = arith.constant 0 : i32
    %c0_i32_1 = arith.constant 0 : i32
    return %c0_i32, %c0_i32_0 : i32, i32
  }
  func.func @transform_10(%arg0: i32) -> (i32, i32) {
    %c0_i32 = arith.constant 0 : i32
    %c0_i32_0 = arith.constant 0 : i32
    %c0_i32_1 = arith.constant 0 : i32
    return %c0_i32, %c0_i32_0 : i32, i32
  }
  func.func @transform_11(%arg0: i32) -> (i32, i32) {
    %c0_i32 = arith.constant 0 : i32
    %c0_i32_0 = arith.constant 0 : i32
    %c0_i32_1 = arith.constant 0 : i32
    return %c0_i32, %c0_i32_0 : i32, i32
  }
  func.func @transform_12(%arg0: i32) -> (i32, i32) {
    %c0_i32 = arith.constant 0 : i32
    %c0_i32_0 = arith.constant 0 : i32
    %c0_i32_1 = arith.constant 0 : i32
    return %c0_i32, %c0_i32_0 : i32, i32
  }
  func.func @transform_13(%arg0: i32) -> (i32, i32) {
    %c0_i32 = arith.constant 0 : i32
    %c0_i32_0 = arith.constant 0 : i32
    %c0_i32_1 = arith.constant 0 : i32
    return %c0_i32, %c0_i32_0 : i32, i32
  }
  func.func @transform_14(%arg0: i32) -> (i32, i32, i32) {
    %c0_i32 = arith.constant 0 : i32
    %c0_i32_0 = arith.constant 0 : i32
    %c0_i32_1 = arith.constant 0 : i32
    return %arg0, %c0_i32, %c0_i32_0 : i32, i32, i32
  }
}

module attributes {stable_mosaic.version = 11 : i64} {
  func.func @_decoder_layer_kernel(%arg0: i32, %arg1: memref<1x8x32xf32, #tpu.memory_space<vmem>>, %arg2: memref<1x1x8xf32, #tpu.memory_space<vmem>>, %arg3: memref<1x32xf32, #tpu.memory_space<vmem>>, %arg4: memref<1x32xf32, #tpu.memory_space<vmem>>, %arg5: memref<32x96xbf16, #tpu.memory_space<vmem>>, %arg6: memref<1x96xf32, #tpu.memory_space<vmem>>, %arg7: memref<32x32xbf16, #tpu.memory_space<vmem>>, %arg8: memref<1x32xf32, #tpu.memory_space<vmem>>, %arg9: memref<1x32xf32, #tpu.memory_space<vmem>>, %arg10: memref<1x32xf32, #tpu.memory_space<vmem>>, %arg11: memref<32x64xbf16, #tpu.memory_space<vmem>>, %arg12: memref<1x64xf32, #tpu.memory_space<vmem>>, %arg13: memref<64x32xbf16, #tpu.memory_space<vmem>>, %arg14: memref<1x32xf32, #tpu.memory_space<vmem>>, %arg15: memref<1x8x32xf32, #tpu.memory_space<vmem>>, %arg16: memref<1x8x32xbf16, #tpu.memory_space<vmem>>) attributes {dimension_semantics = [#tpu.dimension_semantics<parallel>], iteration_bounds = array<i64: 2>, scalar_prefetch = 0 : i64, scratch_operands = 1 : i64, tpu.core_type = #tpu.core_type<tc>, window_params = [{transform_indices = @transform_0, window_bounds = array<i64: 1, 8, 32>}, {transform_indices = @transform_1, window_bounds = array<i64: 1, 1, 8>}, {pipeline_mode = #tpu.pipeline_mode<synchronous>, transform_indices = @transform_2, window_bounds = array<i64: 1, 32>}, {pipeline_mode = #tpu.pipeline_mode<synchronous>, transform_indices = @transform_3, window_bounds = array<i64: 1, 32>}, {pipeline_mode = #tpu.pipeline_mode<synchronous>, transform_indices = @transform_4, window_bounds = array<i64: 32, 96>}, {pipeline_mode = #tpu.pipeline_mode<synchronous>, transform_indices = @transform_5, window_bounds = array<i64: 1, 96>}, {pipeline_mode = #tpu.pipeline_mode<synchronous>, transform_indices = @transform_6, window_bounds = array<i64: 32, 32>}, {pipeline_mode = #tpu.pipeline_mode<synchronous>, transform_indices = @transform_7, window_bounds = array<i64: 1, 32>}, {pipeline_mode = #tpu.pipeline_mode<synchronous>, transform_indices = @transform_8, window_bounds = array<i64: 1, 32>}, {pipeline_mode = #tpu.pipeline_mode<synchronous>, transform_indices = @transform_9, window_bounds = array<i64: 1, 32>}, {pipeline_mode = #tpu.pipeline_mode<synchronous>, transform_indices = @transform_10, window_bounds = array<i64: 32, 64>}, {pipeline_mode = #tpu.pipeline_mode<synchronous>, transform_indices = @transform_11, window_bounds = array<i64: 1, 64>}, {pipeline_mode = #tpu.pipeline_mode<synchronous>, transform_indices = @transform_12, window_bounds = array<i64: 64, 32>}, {pipeline_mode = #tpu.pipeline_mode<synchronous>, transform_indices = @transform_13, window_bounds = array<i64: 1, 32>}, {transform_indices = @transform_14, window_bounds = array<i64: 1, 8, 32>}]} {
    %c0 = arith.constant 0 : index
    %c0_0 = arith.constant 0 : index
    %c0_1 = arith.constant 0 : index
    %0 = vector.load %arg1[%c0, %c0_0, %c0_1] : memref<1x8x32xf32, #tpu.memory_space<vmem>>, vector<1x8x32xf32>
    %1 = vector.shape_cast %0 : vector<1x8x32xf32> to vector<8x32xf32>
    %c0_2 = arith.constant 0 : index
    %c0_3 = arith.constant 0 : index
    %2 = vector.load %arg3[%c0_2, %c0_3] : memref<1x32xf32, #tpu.memory_space<vmem>>, vector<1x32xf32>
    %c0_4 = arith.constant 0 : index
    %c0_5 = arith.constant 0 : index
    %3 = vector.load %arg4[%c0_4, %c0_5] : memref<1x32xf32, #tpu.memory_space<vmem>>, vector<1x32xf32>
    %cst = arith.constant dense<0.000000e+00> : vector<8xf32>
    %4 = vector.multi_reduction <add>, %1, %cst [1] : vector<8x32xf32> to vector<8xf32>
    %5 = vector.shape_cast %4 : vector<8xf32> to vector<8x1xf32>
    %cst_6 = arith.constant 3.200000e+01 : f32
    %6 = vector.broadcast %cst_6 : f32 to vector<8x1xf32>
    %7 = arith.divf %5, %6 : vector<8x1xf32>
    %8 = vector.broadcast %7 : vector<8x1xf32> to vector<8x32xf32>
    %9 = arith.subf %1, %8 : vector<8x32xf32>
    %10 = arith.mulf %9, %9 : vector<8x32xf32>
    %cst_7 = arith.constant dense<0.000000e+00> : vector<8xf32>
    %11 = vector.multi_reduction <add>, %10, %cst_7 [1] : vector<8x32xf32> to vector<8xf32>
    %12 = vector.shape_cast %11 : vector<8xf32> to vector<8x1xf32>
    %cst_8 = arith.constant 3.200000e+01 : f32
    %13 = vector.broadcast %cst_8 : f32 to vector<8x1xf32>
    %14 = arith.divf %12, %13 : vector<8x1xf32>
    %cst_9 = arith.constant 9.99999974E-6 : f32
    %15 = vector.broadcast %cst_9 : f32 to vector<8x1xf32>
    %16 = arith.addf %14, %15 : vector<8x1xf32>
    %17 = math.rsqrt %16 : vector<8x1xf32>
    %18 = vector.broadcast %17 : vector<8x1xf32> to vector<8x32xf32>
    %19 = arith.mulf %9, %18 : vector<8x32xf32>
    %20 = vector.broadcast %2 : vector<1x32xf32> to vector<8x32xf32>
    %21 = arith.mulf %19, %20 : vector<8x32xf32>
    %22 = vector.broadcast %3 : vector<1x32xf32> to vector<8x32xf32>
    %23 = arith.addf %21, %22 : vector<8x32xf32>
    %24 = arith.truncf %23 : vector<8x32xf32> to vector<8x32xbf16>
    %c0_10 = arith.constant 0 : index
    %c0_11 = arith.constant 0 : index
    %25 = vector.load %arg5[%c0_10, %c0_11] : memref<32x96xbf16, #tpu.memory_space<vmem>>, vector<32x96xbf16>
    %cst_12 = arith.constant dense<0.000000e+00> : vector<8x96xf32>
    %26 = tpu.matmul %24, %25, %cst_12 {dimension_numbers = #tpu.dot_dimension_numbers<[1], [0], [0], [1], [0, 0, 1, 1], [], []>} : vector<8x32xbf16>, vector<32x96xbf16>, vector<8x96xf32> -> vector<8x96xf32>
    %c0_13 = arith.constant 0 : index
    %c0_14 = arith.constant 0 : index
    %27 = vector.load %arg6[%c0_13, %c0_14] : memref<1x96xf32, #tpu.memory_space<vmem>>, vector<1x96xf32>
    %28 = vector.broadcast %27 : vector<1x96xf32> to vector<8x96xf32>
    %29 = arith.addf %26, %28 : vector<8x96xf32>
    %30 = vector.extract_strided_slice %29 {offsets = [0, 0], sizes = [8, 32], strides = [1, 1]} : vector<8x96xf32> to vector<8x32xf32>
    %31 = arith.truncf %30 : vector<8x32xf32> to vector<8x32xbf16>
    %32 = vector.shape_cast %31 : vector<8x32xbf16> to vector<1x8x32xbf16>
    %33 = vector.extract_strided_slice %29 {offsets = [0, 32], sizes = [8, 32], strides = [1, 1]} : vector<8x96xf32> to vector<8x32xf32>
    %34 = arith.truncf %33 : vector<8x32xf32> to vector<8x32xbf16>
    %35 = vector.shape_cast %34 : vector<8x32xbf16> to vector<1x8x32xbf16>
    %36 = vector.extract_strided_slice %29 {offsets = [0, 64], sizes = [8, 32], strides = [1, 1]} : vector<8x96xf32> to vector<8x32xf32>
    %37 = arith.truncf %36 : vector<8x32xf32> to vector<8x32xbf16>
    %38 = vector.shape_cast %37 : vector<8x32xbf16> to vector<1x8x32xbf16>
    %c0_15 = arith.constant 0 : index
    %c0_16 = arith.constant 0 : index
    %c0_17 = arith.constant 0 : index
    %39 = vector.load %arg2[%c0_15, %c0_16, %c0_17] : memref<1x1x8xf32, #tpu.memory_space<vmem>>, vector<1x1x8xf32>
    %cst_18 = arith.constant 0.000000e+00 : f32
    %40 = vector.broadcast %cst_18 : f32 to vector<1x1x8xf32>
    %41 = arith.cmpf oeq, %39, %40 : vector<1x1x8xf32>
    %cst_19 = arith.constant -1.000000e+09 : f32
    %cst_20 = arith.constant 0.000000e+00 : f32
    %42 = vector.broadcast %cst_19 : f32 to vector<1x1x8xf32>
    %43 = vector.broadcast %cst_20 : f32 to vector<1x1x8xf32>
    %44 = arith.select %41, %42, %43 : vector<1x1x8xi1>, vector<1x1x8xf32>
    %45 = vector.shape_cast %44 : vector<1x1x8xf32> to vector<1x1x8xf32>
    %46 = vector.broadcast %45 : vector<1x1x8xf32> to vector<1x8x8xf32>
    %47 = vector.extract_strided_slice %32 {offsets = [0, 0, 0], sizes = [1, 8, 8], strides = [1, 1, 1]} : vector<1x8x32xbf16> to vector<1x8x8xbf16>
    %48 = vector.extract_strided_slice %35 {offsets = [0, 0, 0], sizes = [1, 8, 8], strides = [1, 1, 1]} : vector<1x8x32xbf16> to vector<1x8x8xbf16>
    "tpu.trace_start"() <{level = 10 : i32, message = "bqd,bkd->bqk"}> : () -> ()
    %cst_21 = arith.constant dense<0.000000e+00> : vector<1x8x8xf32>
    %49 = tpu.matmul %47, %48, %cst_21 {dimension_numbers = #tpu.dot_dimension_numbers<[2], [2], [1], [1], [0, 0, 0, 1, 1, 1], [0], [0]>} : vector<1x8x8xbf16>, vector<1x8x8xbf16>, vector<1x8x8xf32> -> vector<1x8x8xf32>
    "tpu.trace_stop"() : () -> ()
    %50 = arith.addf %49, %46 : vector<1x8x8xf32>
    %cst_22 = arith.constant dense<0xFF800000> : vector<1x8xf32>
    %51 = vector.multi_reduction <maximumf>, %50, %cst_22 [2] : vector<1x8x8xf32> to vector<1x8xf32>
    %52 = vector.shape_cast %51 : vector<1x8xf32> to vector<1x8x1xf32>
    %53 = vector.broadcast %52 : vector<1x8x1xf32> to vector<1x8x8xf32>
    %54 = arith.subf %50, %53 : vector<1x8x8xf32>
    %55 = math.exp %54 : vector<1x8x8xf32>
    %cst_23 = arith.constant dense<0.000000e+00> : vector<1x8xf32>
    %56 = vector.multi_reduction <add>, %55, %cst_23 [2] : vector<1x8x8xf32> to vector<1x8xf32>
    %57 = vector.shape_cast %56 : vector<1x8xf32> to vector<1x8x1xf32>
    %58 = tpu.reciprocal %57 {approx = true} : vector<1x8x1xf32> -> vector<1x8x1xf32>
    %59 = vector.broadcast %58 : vector<1x8x1xf32> to vector<1x8x8xf32>
    %60 = arith.mulf %55, %59 : vector<1x8x8xf32>
    %61 = arith.truncf %60 : vector<1x8x8xf32> to vector<1x8x8xbf16>
    %62 = vector.extract_strided_slice %38 {offsets = [0, 0, 0], sizes = [1, 8, 8], strides = [1, 1, 1]} : vector<1x8x32xbf16> to vector<1x8x8xbf16>
    "tpu.trace_start"() <{level = 10 : i32, message = "bqk,bkd->bqd"}> : () -> ()
    %cst_24 = arith.constant dense<0.000000e+00> : vector<1x8x8xf32>
    %63 = tpu.matmul %61, %62, %cst_24 {dimension_numbers = #tpu.dot_dimension_numbers<[2], [1], [1], [2], [0, 0, 0, 1, 1, 2], [0], [0]>} : vector<1x8x8xbf16>, vector<1x8x8xbf16>, vector<1x8x8xf32> -> vector<1x8x8xf32>
    "tpu.trace_stop"() : () -> ()
    %64 = arith.truncf %63 : vector<1x8x8xf32> to vector<1x8x8xbf16>
    %c0_25 = arith.constant 0 : index
    %c0_26 = arith.constant 0 : index
    %c0_27 = arith.constant 0 : index
    %65 = vector.load %arg16[%c0_25, %c0_26, %c0_27] : memref<1x8x32xbf16, #tpu.memory_space<vmem>>, vector<1x8x8xbf16>
    tpu.vector_store %arg16[%c0_25, %c0_26, %c0_27], %64 {strides = array<i32>} : memref<1x8x32xbf16, #tpu.memory_space<vmem>>, vector<1x8x8xbf16>,
    %66 = vector.extract_strided_slice %32 {offsets = [0, 0, 8], sizes = [1, 8, 8], strides = [1, 1, 1]} : vector<1x8x32xbf16> to vector<1x8x8xbf16>
    %67 = vector.extract_strided_slice %35 {offsets = [0, 0, 8], sizes = [1, 8, 8], strides = [1, 1, 1]} : vector<1x8x32xbf16> to vector<1x8x8xbf16>
    "tpu.trace_start"() <{level = 10 : i32, message = "bqd,bkd->bqk"}> : () -> ()
    %cst_28 = arith.constant dense<0.000000e+00> : vector<1x8x8xf32>
    %68 = tpu.matmul %66, %67, %cst_28 {dimension_numbers = #tpu.dot_dimension_numbers<[2], [2], [1], [1], [0, 0, 0, 1, 1, 1], [0], [0]>} : vector<1x8x8xbf16>, vector<1x8x8xbf16>, vector<1x8x8xf32> -> vector<1x8x8xf32>
    "tpu.trace_stop"() : () -> ()
    %69 = arith.addf %68, %46 : vector<1x8x8xf32>
    %cst_29 = arith.constant dense<0xFF800000> : vector<1x8xf32>
    %70 = vector.multi_reduction <maximumf>, %69, %cst_29 [2] : vector<1x8x8xf32> to vector<1x8xf32>
    %71 = vector.shape_cast %70 : vector<1x8xf32> to vector<1x8x1xf32>
    %72 = vector.broadcast %71 : vector<1x8x1xf32> to vector<1x8x8xf32>
    %73 = arith.subf %69, %72 : vector<1x8x8xf32>
    %74 = math.exp %73 : vector<1x8x8xf32>
    %cst_30 = arith.constant dense<0.000000e+00> : vector<1x8xf32>
    %75 = vector.multi_reduction <add>, %74, %cst_30 [2] : vector<1x8x8xf32> to vector<1x8xf32>
    %76 = vector.shape_cast %75 : vector<1x8xf32> to vector<1x8x1xf32>
    %77 = tpu.reciprocal %76 {approx = true} : vector<1x8x1xf32> -> vector<1x8x1xf32>
    %78 = vector.broadcast %77 : vector<1x8x1xf32> to vector<1x8x8xf32>
    %79 = arith.mulf %74, %78 : vector<1x8x8xf32>
    %80 = arith.truncf %79 : vector<1x8x8xf32> to vector<1x8x8xbf16>
    %81 = vector.extract_strided_slice %38 {offsets = [0, 0, 8], sizes = [1, 8, 8], strides = [1, 1, 1]} : vector<1x8x32xbf16> to vector<1x8x8xbf16>
    "tpu.trace_start"() <{level = 10 : i32, message = "bqk,bkd->bqd"}> : () -> ()
    %cst_31 = arith.constant dense<0.000000e+00> : vector<1x8x8xf32>
    %82 = tpu.matmul %80, %81, %cst_31 {dimension_numbers = #tpu.dot_dimension_numbers<[2], [1], [1], [2], [0, 0, 0, 1, 1, 2], [0], [0]>} : vector<1x8x8xbf16>, vector<1x8x8xbf16>, vector<1x8x8xf32> -> vector<1x8x8xf32>
    "tpu.trace_stop"() : () -> ()
    %83 = arith.truncf %82 : vector<1x8x8xf32> to vector<1x8x8xbf16>
    %c0_32 = arith.constant 0 : index
    %c0_33 = arith.constant 0 : index
    %c8 = arith.constant 8 : index
    %84 = vector.load %arg16[%c0_32, %c0_33, %c8] : memref<1x8x32xbf16, #tpu.memory_space<vmem>>, vector<1x8x8xbf16>
    tpu.vector_store %arg16[%c0_32, %c0_33, %c8], %83 {strides = array<i32>} : memref<1x8x32xbf16, #tpu.memory_space<vmem>>, vector<1x8x8xbf16>,
    %85 = vector.extract_strided_slice %32 {offsets = [0, 0, 16], sizes = [1, 8, 8], strides = [1, 1, 1]} : vector<1x8x32xbf16> to vector<1x8x8xbf16>
    %86 = vector.extract_strided_slice %35 {offsets = [0, 0, 16], sizes = [1, 8, 8], strides = [1, 1, 1]} : vector<1x8x32xbf16> to vector<1x8x8xbf16>
    "tpu.trace_start"() <{level = 10 : i32, message = "bqd,bkd->bqk"}> : () -> ()
    %cst_34 = arith.constant dense<0.000000e+00> : vector<1x8x8xf32>
    %87 = tpu.matmul %85, %86, %cst_34 {dimension_numbers = #tpu.dot_dimension_numbers<[2], [2], [1], [1], [0, 0, 0, 1, 1, 1], [0], [0]>} : vector<1x8x8xbf16>, vector<1x8x8xbf16>, vector<1x8x8xf32> -> vector<1x8x8xf32>
    "tpu.trace_stop"() : () -> ()
    %88 = arith.addf %87, %46 : vector<1x8x8xf32>
    %cst_35 = arith.constant dense<0xFF800000> : vector<1x8xf32>
    %89 = vector.multi_reduction <maximumf>, %88, %cst_35 [2] : vector<1x8x8xf32> to vector<1x8xf32>
    %90 = vector.shape_cast %89 : vector<1x8xf32> to vector<1x8x1xf32>
    %91 = vector.broadcast %90 : vector<1x8x1xf32> to vector<1x8x8xf32>
    %92 = arith.subf %88, %91 : vector<1x8x8xf32>
    %93 = math.exp %92 : vector<1x8x8xf32>
    %cst_36 = arith.constant dense<0.000000e+00> : vector<1x8xf32>
    %94 = vector.multi_reduction <add>, %93, %cst_36 [2] : vector<1x8x8xf32> to vector<1x8xf32>
    %95 = vector.shape_cast %94 : vector<1x8xf32> to vector<1x8x1xf32>
    %96 = tpu.reciprocal %95 {approx = true} : vector<1x8x1xf32> -> vector<1x8x1xf32>
    %97 = vector.broadcast %96 : vector<1x8x1xf32> to vector<1x8x8xf32>
    %98 = arith.mulf %93, %97 : vector<1x8x8xf32>
    %99 = arith.truncf %98 : vector<1x8x8xf32> to vector<1x8x8xbf16>
    %100 = vector.extract_strided_slice %38 {offsets = [0, 0, 16], sizes = [1, 8, 8], strides = [1, 1, 1]} : vector<1x8x32xbf16> to vector<1x8x8xbf16>
    "tpu.trace_start"() <{level = 10 : i32, message = "bqk,bkd->bqd"}> : () -> ()
    %cst_37 = arith.constant dense<0.000000e+00> : vector<1x8x8xf32>
    %101 = tpu.matmul %99, %100, %cst_37 {dimension_numbers = #tpu.dot_dimension_numbers<[2], [1], [1], [2], [0, 0, 0, 1, 1, 2], [0], [0]>} : vector<1x8x8xbf16>, vector<1x8x8xbf16>, vector<1x8x8xf32> -> vector<1x8x8xf32>
    "tpu.trace_stop"() : () -> ()
    %102 = arith.truncf %101 : vector<1x8x8xf32> to vector<1x8x8xbf16>
    %c0_38 = arith.constant 0 : index
    %c0_39 = arith.constant 0 : index
    %c16 = arith.constant 16 : index
    %103 = vector.load %arg16[%c0_38, %c0_39, %c16] : memref<1x8x32xbf16, #tpu.memory_space<vmem>>, vector<1x8x8xbf16>
    tpu.vector_store %arg16[%c0_38, %c0_39, %c16], %102 {strides = array<i32>} : memref<1x8x32xbf16, #tpu.memory_space<vmem>>, vector<1x8x8xbf16>,
    %104 = vector.extract_strided_slice %32 {offsets = [0, 0, 24], sizes = [1, 8, 8], strides = [1, 1, 1]} : vector<1x8x32xbf16> to vector<1x8x8xbf16>
    %105 = vector.extract_strided_slice %35 {offsets = [0, 0, 24], sizes = [1, 8, 8], strides = [1, 1, 1]} : vector<1x8x32xbf16> to vector<1x8x8xbf16>
    "tpu.trace_start"() <{level = 10 : i32, message = "bqd,bkd->bqk"}> : () -> ()
    %cst_40 = arith.constant dense<0.000000e+00> : vector<1x8x8xf32>
    %106 = tpu.matmul %104, %105, %cst_40 {dimension_numbers = #tpu.dot_dimension_numbers<[2], [2], [1], [1], [0, 0, 0, 1, 1, 1], [0], [0]>} : vector<1x8x8xbf16>, vector<1x8x8xbf16>, vector<1x8x8xf32> -> vector<1x8x8xf32>
    "tpu.trace_stop"() : () -> ()
    %107 = arith.addf %106, %46 : vector<1x8x8xf32>
    %cst_41 = arith.constant dense<0xFF800000> : vector<1x8xf32>
    %108 = vector.multi_reduction <maximumf>, %107, %cst_41 [2] : vector<1x8x8xf32> to vector<1x8xf32>
    %109 = vector.shape_cast %108 : vector<1x8xf32> to vector<1x8x1xf32>
    %110 = vector.broadcast %109 : vector<1x8x1xf32> to vector<1x8x8xf32>
    %111 = arith.subf %107, %110 : vector<1x8x8xf32>
    %112 = math.exp %111 : vector<1x8x8xf32>
    %cst_42 = arith.constant dense<0.000000e+00> : vector<1x8xf32>
    %113 = vector.multi_reduction <add>, %112, %cst_42 [2] : vector<1x8x8xf32> to vector<1x8xf32>
    %114 = vector.shape_cast %113 : vector<1x8xf32> to vector<1x8x1xf32>
    %115 = tpu.reciprocal %114 {approx = true} : vector<1x8x1xf32> -> vector<1x8x1xf32>
    %116 = vector.broadcast %115 : vector<1x8x1xf32> to vector<1x8x8xf32>
    %117 = arith.mulf %112, %116 : vector<1x8x8xf32>
    %118 = arith.truncf %117 : vector<1x8x8xf32> to vector<1x8x8xbf16>
    %119 = vector.extract_strided_slice %38 {offsets = [0, 0, 24], sizes = [1, 8, 8], strides = [1, 1, 1]} : vector<1x8x32xbf16> to vector<1x8x8xbf16>
    "tpu.trace_start"() <{level = 10 : i32, message = "bqk,bkd->bqd"}> : () -> ()
    %cst_43 = arith.constant dense<0.000000e+00> : vector<1x8x8xf32>
    %120 = tpu.matmul %118, %119, %cst_43 {dimension_numbers = #tpu.dot_dimension_numbers<[2], [1], [1], [2], [0, 0, 0, 1, 1, 2], [0], [0]>} : vector<1x8x8xbf16>, vector<1x8x8xbf16>, vector<1x8x8xf32> -> vector<1x8x8xf32>
    "tpu.trace_stop"() : () -> ()
    %121 = arith.truncf %120 : vector<1x8x8xf32> to vector<1x8x8xbf16>
    %c0_44 = arith.constant 0 : index
    %c0_45 = arith.constant 0 : index
    %c24 = arith.constant 24 : index
    %122 = vector.load %arg16[%c0_44, %c0_45, %c24] : memref<1x8x32xbf16, #tpu.memory_space<vmem>>, vector<1x8x8xbf16>
    tpu.vector_store %arg16[%c0_44, %c0_45, %c24], %121 {strides = array<i32>} : memref<1x8x32xbf16, #tpu.memory_space<vmem>>, vector<1x8x8xbf16>,
    %c0_46 = arith.constant 0 : index
    %c0_47 = arith.constant 0 : index
    %c0_48 = arith.constant 0 : index
    %123 = vector.load %arg16[%c0_46, %c0_47, %c0_48] : memref<1x8x32xbf16, #tpu.memory_space<vmem>>, vector<1x8x32xbf16>
    %124 = vector.shape_cast %123 : vector<1x8x32xbf16> to vector<8x32xbf16>
    %c0_49 = arith.constant 0 : index
    %c0_50 = arith.constant 0 : index
    %125 = vector.load %arg7[%c0_49, %c0_50] : memref<32x32xbf16, #tpu.memory_space<vmem>>, vector<32x32xbf16>
    %cst_51 = arith.constant dense<0.000000e+00> : vector<8x32xf32>
    %126 = tpu.matmul %124, %125, %cst_51 {dimension_numbers = #tpu.dot_dimension_numbers<[1], [0], [0], [1], [0, 0, 1, 1], [], []>} : vector<8x32xbf16>, vector<32x32xbf16>, vector<8x32xf32> -> vector<8x32xf32>
    %c0_52 = arith.constant 0 : index
    %c0_53 = arith.constant 0 : index
    %127 = vector.load %arg8[%c0_52, %c0_53] : memref<1x32xf32, #tpu.memory_space<vmem>>, vector<1x32xf32>
    %128 = vector.broadcast %127 : vector<1x32xf32> to vector<8x32xf32>
    %129 = arith.addf %126, %128 : vector<8x32xf32>
    %130 = arith.addf %1, %129 : vector<8x32xf32>
    %c0_54 = arith.constant 0 : index
    %c0_55 = arith.constant 0 : index
    %131 = vector.load %arg9[%c0_54, %c0_55] : memref<1x32xf32, #tpu.memory_space<vmem>>, vector<1x32xf32>
    %c0_56 = arith.constant 0 : index
    %c0_57 = arith.constant 0 : index
    %132 = vector.load %arg10[%c0_56, %c0_57] : memref<1x32xf32, #tpu.memory_space<vmem>>, vector<1x32xf32>
    %cst_58 = arith.constant dense<0.000000e+00> : vector<8xf32>
    %133 = vector.multi_reduction <add>, %130, %cst_58 [1] : vector<8x32xf32> to vector<8xf32>
    %134 = vector.shape_cast %133 : vector<8xf32> to vector<8x1xf32>
    %cst_59 = arith.constant 3.200000e+01 : f32
    %135 = vector.broadcast %cst_59 : f32 to vector<8x1xf32>
    %136 = arith.divf %134, %135 : vector<8x1xf32>
    %137 = vector.broadcast %136 : vector<8x1xf32> to vector<8x32xf32>
    %138 = arith.subf %130, %137 : vector<8x32xf32>
    %139 = arith.mulf %138, %138 : vector<8x32xf32>
    %cst_60 = arith.constant dense<0.000000e+00> : vector<8xf32>
    %140 = vector.multi_reduction <add>, %139, %cst_60 [1] : vector<8x32xf32> to vector<8xf32>
    %141 = vector.shape_cast %140 : vector<8xf32> to vector<8x1xf32>
    %cst_61 = arith.constant 3.200000e+01 : f32
    %142 = vector.broadcast %cst_61 : f32 to vector<8x1xf32>
    %143 = arith.divf %141, %142 : vector<8x1xf32>
    %cst_62 = arith.constant 9.99999974E-6 : f32
    %144 = vector.broadcast %cst_62 : f32 to vector<8x1xf32>
    %145 = arith.addf %143, %144 : vector<8x1xf32>
    %146 = math.rsqrt %145 : vector<8x1xf32>
    %147 = vector.broadcast %146 : vector<8x1xf32> to vector<8x32xf32>
    %148 = arith.mulf %138, %147 : vector<8x32xf32>
    %149 = vector.broadcast %131 : vector<1x32xf32> to vector<8x32xf32>
    %150 = arith.mulf %148, %149 : vector<8x32xf32>
    %151 = vector.broadcast %132 : vector<1x32xf32> to vector<8x32xf32>
    %152 = arith.addf %150, %151 : vector<8x32xf32>
    %153 = arith.truncf %152 : vector<8x32xf32> to vector<8x32xbf16>
    %c0_63 = arith.constant 0 : index
    %c0_64 = arith.constant 0 : index
    %154 = vector.load %arg11[%c0_63, %c0_64] : memref<32x64xbf16, #tpu.memory_space<vmem>>, vector<32x64xbf16>
    %cst_65 = arith.constant dense<0.000000e+00> : vector<8x64xf32>
    %155 = tpu.matmul %153, %154, %cst_65 {dimension_numbers = #tpu.dot_dimension_numbers<[1], [0], [0], [1], [0, 0, 1, 1], [], []>} : vector<8x32xbf16>, vector<32x64xbf16>, vector<8x64xf32> -> vector<8x64xf32>
    %c0_66 = arith.constant 0 : index
    %c0_67 = arith.constant 0 : index
    %156 = vector.load %arg12[%c0_66, %c0_67] : memref<1x64xf32, #tpu.memory_space<vmem>>, vector<1x64xf32>
    %157 = vector.broadcast %156 : vector<1x64xf32> to vector<8x64xf32>
    %158 = arith.addf %155, %157 : vector<8x64xf32>
    %cst_68 = arith.constant 0.000000e+00 : f32
    %159 = vector.broadcast %cst_68 : f32 to vector<8x64xf32>
    %160 = arith.maximumf %158, %159 : vector<8x64xf32>
    %161 = arith.truncf %160 : vector<8x64xf32> to vector<8x64xbf16>
    %c0_69 = arith.constant 0 : index
    %c0_70 = arith.constant 0 : index
    %162 = vector.load %arg13[%c0_69, %c0_70] : memref<64x32xbf16, #tpu.memory_space<vmem>>, vector<64x32xbf16>
    %cst_71 = arith.constant dense<0.000000e+00> : vector<8x32xf32>
    %163 = tpu.matmul %161, %162, %cst_71 {dimension_numbers = #tpu.dot_dimension_numbers<[1], [0], [0], [1], [0, 0, 1, 1], [], []>} : vector<8x64xbf16>, vector<64x32xbf16>, vector<8x32xf32> -> vector<8x32xf32>
    %c0_72 = arith.constant 0 : index
    %c0_73 = arith.constant 0 : index
    %164 = vector.load %arg14[%c0_72, %c0_73] : memref<1x32xf32, #tpu.memory_space<vmem>>, vector<1x32xf32>
    %165 = vector.broadcast %164 : vector<1x32xf32> to vector<8x32xf32>
    %166 = arith.addf %163, %165 : vector<8x32xf32>
    %167 = arith.addf %130, %166 : vector<8x32xf32>
    %168 = vector.shape_cast %167 : vector<8x32xf32> to vector<1x8x32xf32>
    %c0_74 = arith.constant 0 : index
    %c0_75 = arith.constant 0 : index
    %c0_76 = arith.constant 0 : index
    %169 = vector.load %arg15[%c0_74, %c0_75, %c0_76] : memref<1x8x32xf32, #tpu.memory_space<vmem>>, vector<1x8x32xf32>
    tpu.vector_store %arg15[%c0_74, %c0_75, %c0_76], %168 {strides = array<i32>} : memref<1x8x32xf32, #tpu.memory_space<vmem>>, vector<1x8x32xf32>,
    return
  }
  func.func @transform_0(%arg0: i32) -> (i32, i32, i32) {
    %c0_i32 = arith.constant 0 : i32
    %c0_i32_0 = arith.constant 0 : i32
    %c0_i32_1 = arith.constant 0 : i32
    return %arg0, %c0_i32, %c0_i32_0 : i32, i32, i32
  }
  func.func @transform_1(%arg0: i32) -> (i32, i32, i32) {
    %c0_i32 = arith.constant 0 : i32
    %c0_i32_0 = arith.constant 0 : i32
    %c0_i32_1 = arith.constant 0 : i32
    return %arg0, %c0_i32, %c0_i32_0 : i32, i32, i32
  }
  func.func @transform_2(%arg0: i32) -> (i32, i32) {
    %c0_i32 = arith.constant 0 : i32
    %c0_i32_0 = arith.constant 0 : i32
    %c0_i32_1 = arith.constant 0 : i32
    return %c0_i32, %c0_i32_0 : i32, i32
  }
  func.func @transform_3(%arg0: i32) -> (i32, i32) {
    %c0_i32 = arith.constant 0 : i32
    %c0_i32_0 = arith.constant 0 : i32
    %c0_i32_1 = arith.constant 0 : i32
    return %c0_i32, %c0_i32_0 : i32, i32
  }
  func.func @transform_4(%arg0: i32) -> (i32, i32) {
    %c0_i32 = arith.constant 0 : i32
    %c0_i32_0 = arith.constant 0 : i32
    %c0_i32_1 = arith.constant 0 : i32
    return %c0_i32, %c0_i32_0 : i32, i32
  }
  func.func @transform_5(%arg0: i32) -> (i32, i32) {
    %c0_i32 = arith.constant 0 : i32
    %c0_i32_0 = arith.constant 0 : i32
    %c0_i32_1 = arith.constant 0 : i32
    return %c0_i32, %c0_i32_0 : i32, i32
  }
  func.func @transform_6(%arg0: i32) -> (i32, i32) {
    %c0_i32 = arith.constant 0 : i32
    %c0_i32_0 = arith.constant 0 : i32
    %c0_i32_1 = arith.constant 0 : i32
    return %c0_i32, %c0_i32_0 : i32, i32
  }
  func.func @transform_7(%arg0: i32) -> (i32, i32) {
    %c0_i32 = arith.constant 0 : i32
    %c0_i32_0 = arith.constant 0 : i32
    %c0_i32_1 = arith.constant 0 : i32
    return %c0_i32, %c0_i32_0 : i32, i32
  }
  func.func @transform_8(%arg0: i32) -> (i32, i32) {
    %c0_i32 = arith.constant 0 : i32
    %c0_i32_0 = arith.constant 0 : i32
    %c0_i32_1 = arith.constant 0 : i32
    return %c0_i32, %c0_i32_0 : i32, i32
  }
  func.func @transform_9(%arg0: i32) -> (i32, i32) {
    %c0_i32 = arith.constant 0 : i32
    %c0_i32_0 = arith.constant 0 : i32
    %c0_i32_1 = arith.constant 0 : i32
    return %c0_i32, %c0_i32_0 : i32, i32
  }
  func.func @transform_10(%arg0: i32) -> (i32, i32) {
    %c0_i32 = arith.constant 0 : i32
    %c0_i32_0 = arith.constant 0 : i32
    %c0_i32_1 = arith.constant 0 : i32
    return %c0_i32, %c0_i32_0 : i32, i32
  }
  func.func @transform_11(%arg0: i32) -> (i32, i32) {
    %c0_i32 = arith.constant 0 : i32
    %c0_i32_0 = arith.constant 0 : i32
    %c0_i32_1 = arith.constant 0 : i32
    return %c0_i32, %c0_i32_0 : i32, i32
  }
  func.func @transform_12(%arg0: i32) -> (i32, i32) {
    %c0_i32 = arith.constant 0 : i32
    %c0_i32_0 = arith.constant 0 : i32
    %c0_i32_1 = arith.constant 0 : i32
    return %c0_i32, %c0_i32_0 : i32, i32
  }
  func.func @transform_13(%arg0: i32) -> (i32, i32) {
    %c0_i32 = arith.constant 0 : i32
    %c0_i32_0 = arith.constant 0 : i32
    %c0_i32_1 = arith.constant 0 : i32
    return %c0_i32, %c0_i32_0 : i32, i32
  }
  func.func @transform_14(%arg0: i32) -> (i32, i32, i32) {
    %c0_i32 = arith.constant 0 : i32
    %c0_i32_0 = arith.constant 0 : i32
    %c0_i32_1 = arith.constant 0 : i32
    return %arg0, %c0_i32, %c0_i32_0 : i32, i32, i32
  }
}

</mosaic_0001>

<bundles_post_ra>
// kernel: tpu_custom_call.1
= control target key start
LH: loop header
LB: loop body
LE: loop exit
PB: predicated region body
PF: predicated region fallthrough
CT: control target
= control target key end

     0   :  { %s2589_s0 = inlined_call_operand.vmem [shape: f32[2,8,32], index: 0, kind: input, shape index: {}]   ;;  %s2590_s1 = inlined_call_operand.vmem [shape: f32[2,1,8], index: 1, kind: input, shape index: {}]   ;;  %s2591_s2 = inlined_call_operand.hbm [shape: f32[1,32], index: 2, kind: input, shape index: {}]   ;;  %s2592_s3 = inlined_call_operand.hbm [shape: f32[1,32], index: 3, kind: input, shape index: {}]   ;;  %s2593_s4 = inlined_call_operand.vmem [shape: bf16[32,96], index: 4, kind: input, shape index: {}]   ;;  %s2594_s5 = inlined_call_operand.hbm [shape: f32[1,96], index: 5, kind: input, shape index: {}]   ;;  %s2595_s6 = inlined_call_operand.vmem [shape: bf16[32,32], index: 6, kind: input, shape index: {}]   ;;  %s2596_s7 = inlined_call_operand.hbm [shape: f32[1,32], index: 7, kind: input, shape index: {}]   ;;  %s2597_s8 = inlined_call_operand.hbm [shape: f32[1,32], index: 8, kind: input, shape index: {}]   ;;  %s2598_s9 = inlined_call_operand.hbm [shape: f32[1,32], index: 9, kind: input, shape index: {}]   ;;  %s2599_s10 = inlined_call_operand.vmem [shape: bf16[32,64], index: 10, kind: input, shape index: {}]   ;;  %s2600_s11 = inlined_call_operand.vmem [shape: f32[1,64], index: 11, kind: input, shape index: {}]   ;;  %s2601_s12 = inlined_call_operand.vmem [shape: bf16[64,32], index: 12, kind: input, shape index: {}]   ;;  %s2602_s13 = inlined_call_operand.vmem [shape: f32[1,32], index: 13, kind: input, shape index: {}]   ;;  %s2603_s14 = inlined_call_operand.hbm [shape: f32[2,8,32], index: 14, kind: output, shape index: {}]  }
   0x1   :  { %2616 = sst [smem:[#allocation27_spill]] %s2592_s3 }
   0x2   :  { %2617 = sst [smem:[#allocation28_spill]] %s2603_s14 }
   0x3   :  { %19 = vsyncpa [#allocation4], 0 }
   0x4   :  { %20 = vsyncpa [#allocation7], 0 }
   0x5   :  { %21 = vsyncpa [#allocation10], 0 }
   0x6   :  { %22 = vsyncpa [#allocation13], 0 }
   0x7   :  { %23 = vsyncpa [#allocation5], 0 }
   0x8   :  { %25 = vsyncpa [#allocation5 + $0x1], 0  ;;  %s2191_s29 = smov 0   ;;  %s2193_s30 = smov 0  }
   0x9   :  { %s2195_s15 = smov 0   ;;  %s2197_s16 = smov 0  }
   0xa LB: > { %2618 = sst [smem:[#allocation20_spill]] %s2079_s29  ;;  %s2212_s17 = sadd.s32 4294967295, %s2091_s16   ;;  %s2091_s16 = sphi %s2197_s16, %s2648_s16   ;;  %s2087_s15 = sphi %s2195_s15, %s2650_s15   ;;  %s2083_s30 = sphi %s2193_s30, %s2652_s30   ;;  %s2079_s29 = sphi %s2191_s29, %s2651_s29  }
   0xb   : > { %2619 = sst [smem:[#allocation21_spill]] %s2087_s15  ;;  %s1527_s18 = sadd.s32 4294967294, %s2091_s16  }
   0xc   : > { %2620 = sst [smem:[#allocation22_spill]] %s2091_s16  ;;  %s2216_s19 = sadd.s32 1, %s2091_s16  }
   0xd   : > { %2621 = sst [smem:[#allocation23_spill]] %s2216_s19  ;;  %s342_s20 = sadd.s32 1, %s2087_s15 }
   0xe   : > { %s339_s21 = ssub.s32 %s2091_s16, %s2216_s19  ;;  %p352_p0 = scmp.ne.s32.totalorder %s2087_s15, %s2083_s30 }
   0xf   : > { %p340_p1 = scmp.eq.s32.totalorder %s339_s21, 0  ;;  %p353_p2 = scmp.eq.s32.totalorder %s2212_s17, 1 }
  0x10   : > { %p358_p3 = scmp.ne.s32.totalorder %s2083_s30, %s2079_s29  ;;  %p359_p4 = scmp.eq.s32.totalorder %s1527_s18, 1 }
  0x11   : > { %s2227_s22 = scalar_select %p340_p1, %s2087_s15, %s342_s20  }
  0x12   : > { %p2229_p5 = por %p353_p2, %p352_p0  ;;  %p2233_p6 = por %p359_p4, %p358_p3 }
  0x13   : > { %2622 = sst [smem:[#allocation24_spill]] %s2227_s22  ;;  %p1528_p7 = scmp.ge.s32.totalorder %s2091_s16, 1 }
  0x14   : > { %s2623_s23 = scalar_select %p2229_p5, 1, 0 }
  0x15   : > { %s2625_s24 = scalar_select %p2233_p6, 1, 0 }
  0x16   : > { %2624 = sst [smem:[#allocation25_spill]] %s2623_s23  ;;  %p366_p8 = scmp.lt.s32.totalorder %s2091_s16, 3 }
  0x17   : > { %2626 = sst [smem:[#allocation26_spill]] %s2625_s24  ;;  %p2610_p9 = scmp.eq.s32.totalorder %s2212_s17, 0 }
  0x18   : > { %p2240_p10 = pnand %p1528_p7, %p366_p8  ;;  %s2093_s26 = smov [#allocation6]  }
  0x19   : > { %s390_s27 = sshll.u32 %s2093_s26, 4  ;;  %s2094_s28 = smov [#allocation9]   ;;  %s391_s27 = int_to_ptr.vmem [resolvable:$true] %s390_s27 }
  0x1a   : > { %s2627_s25 = scalar_select %p2240_p10, 1, 0 }
  0x1b   : > { %p1725_p11 = pneg %p2240_p10  ;;  %s418_s18 = sshll.u32 %s2094_s28, 4  ;;  %s2252_s18 = int_to_ptr.vmem [resolvable:$true] %s418_s18 }
  0x1c   : > { %s2095_s21 = smov [#allocation3]   ;;  %s2629_s3 = sld [smem:[#allocation27_spill]] }
  0x1d   : > { %p2248_p12 = pnand %p2610_p9, %p1725_p11  ;;  %s379_s22 = sshll.u32 %s2095_s21, 4  ;;  %s2254_s22 = int_to_ptr.vmem [resolvable:$true] %s379_s22 }
  0x1f   : > { %p2264_p0 = pneg %p2248_p12 }
  0x22   : > { %s1845_s26 = scalar_lea.hbm %s2629_s3, 16 }
  0x23   : > { %p1846_p13 = scmp.ne.s32.totalorder %s2629_s3, %s1845_s26  ;;  %p1852_p3 = scmp.lt.u32.totalorder %s1845_s26, %s2629_s3 }
  0x25   : > { %p1848_p1 = pnand %p2264_p0, %p1846_p13 }
  0x27   : > { %p1849_p2 = pneg %p1848_p1 }
  0x29   : > { %p1854_p4 = pnand %p1852_p3, %p1849_p2 }
  0x2b   : > { %1857 = shalt.err (!%p1854_p4)
}
  0x2c   : > { %s1858_s15 = scalar_lea.vmem %s391_s27, 16  ;;  %s1865_s29 = scalar_lea.vmem %s391_s27, 32 }
  0x2d   : > { %p1859_p7 = scmp.ne.s32.totalorder %s391_s27, %s1858_s15  ;;  %p1866_p9 = scmp.lt.s32.totalorder %s391_s27, %s391_s27 }
  0x2e   : > { %p1867_p6 = scmp.lt.s32.totalorder %s1865_s29, %s1858_s15 }
  0x2f   : > { %p1861_p8 = pnand %p1859_p7, %p2264_p0 }
  0x30   : > { %p1868_p5 = por %p1867_p6, %p1866_p9 }
  0x31   : > { %p1862_p11 = pneg %p1861_p8 }
  0x33   : > { %p1869_p10 = pnand %p1868_p5, %p1862_p11 }
  0x35   : > { %1872 = shalt.err (!%p1869_p10)
}
  0x36   : > { %1731 = dma.hbm_to_vmem [thread:$0]  (!%p2248_p12), %s2629_s3, 16, %s391_s27, [#allocation7]  }
  0x37   : > { %s1873_s21 = scalar_lea.hbm %s2596_s7, 16 }
  0x38   : > { %p1874_p13 = scmp.ne.s32.totalorder %s2596_s7, %s1873_s21  ;;  %p1880_p5 = scmp.lt.u32.totalorder %s1873_s21, %s2596_s7 }
  0x3a   : > { %p1876_p1 = pnand %p1874_p13, %p2264_p0 }
  0x3c   : > { %p1877_p6 = pneg %p1876_p1 }
  0x3e   : > { %p1882_p9 = pnand %p1880_p5, %p1877_p6 }
  0x40   : > { %1885 = shalt.err (!%p1882_p9)
}
  0x41   : > { %s1886_s27 = scalar_lea.vmem %s2252_s18, 16  ;;  %s1893_s14 = scalar_lea.vmem %s2252_s18, 32 }
  0x42   : > { %p1887_p10 = scmp.ne.s32.totalorder %s2252_s18, %s1886_s27  ;;  %p1894_p4 = scmp.lt.s32.totalorder %s2252_s18, %s2252_s18 }
  0x43   : > { %p1895_p7 = scmp.lt.s32.totalorder %s1893_s14, %s1886_s27 }
  0x44   : > { %p1889_p2 = pnand %p1887_p10, %p2264_p0 }
  0x45   : > { %p1896_p8 = por %p1895_p7, %p1894_p4 }
  0x46   : > { %p1890_p3 = pneg %p1889_p2 }
  0x48   : > { %p1897_p11 = pnand %p1896_p8, %p1890_p3 }
  0x4a   : > { %1900 = shalt.err (!%p1897_p11)
}
  0x4b   : > { %1737 = dma.hbm_to_vmem [thread:$0]  (!%p2248_p12), %s2596_s7, 16, %s2252_s18, [#allocation10]  }
  0x4c   : > { %s1901_s26 = scalar_lea.hbm %s2591_s2, 16 }
  0x4d   : > { %p1902_p13 = scmp.ne.s32.totalorder %s2591_s2, %s1901_s26  ;;  %p1908_p5 = scmp.lt.u32.totalorder %s1901_s26, %s2591_s2 }
  0x4f   : > { %p1904_p1 = pnand %p1902_p13, %p2264_p0 }
  0x51   : > { %p1905_p6 = pneg %p1904_p1 }
  0x53   : > { %p1910_p9 = pnand %p1908_p5, %p1905_p6 }
  0x55   : > { %1913 = shalt.err (!%p1910_p9)
}
  0x56   : > { %s1914_s18 = scalar_lea.vmem %s2254_s22, 16  ;;  %s1921_s14 = scalar_lea.vmem %s2254_s22, 32 }
  0x57   : > { %p1915_p10 = scmp.ne.s32.totalorder %s2254_s22, %s1914_s18  ;;  %p1922_p4 = scmp.lt.s32.totalorder %s2254_s22, %s2254_s22 }
  0x58   : > { %p1923_p7 = scmp.lt.s32.totalorder %s1921_s14, %s1914_s18 }
  0x59   : > { %p1917_p2 = pnand %p1915_p10, %p2264_p0 }
  0x5a   : > { %p1924_p8 = por %p1923_p7, %p1922_p4 }
  0x5b   : > { %p1918_p3 = pneg %p1917_p2 }
  0x5d   : > { %p1925_p11 = pnand %p1924_p8, %p1918_p3 }
  0x5f   : > { %1928 = shalt.err (!%p1925_p11)
}
  0x60   : > { %1728 = dma.hbm_to_vmem [thread:$0]  (!%p2248_p12), %s2591_s2, 16, %s2254_s22, [#allocation4]  }
  0x61   : > { %s2096_s24 = smov [#allocation8]   ;;  %s2097_s26 = smov [#allocation11]  }
  0x62   : > { %s404_s16 = sshll.u32 %s2096_s24, 4  ;;  %s429_s21 = sshll.u32 %s2097_s26, 4  ;;  %s405_s16 = int_to_ptr.vmem [resolvable:$true] %s404_s16  ;;  %s430_s21 = int_to_ptr.vmem [resolvable:$true] %s429_s21 }
  0x63   : > { %s1929_s27 = scalar_lea.hbm %s2594_s5, 16 }
  0x64   : > { %p1930_p13 = scmp.ne.s32.totalorder %s2594_s5, %s1929_s27  ;;  %p1936_p5 = scmp.lt.u32.totalorder %s1929_s27, %s2594_s5 }
  0x66   : > { %p1932_p1 = pnand %p1930_p13, %p2264_p0 }
  0x68   : > { %p1933_p6 = pneg %p1932_p1 }
  0x6a   : > { %p1938_p9 = pnand %p1936_p5, %p1933_p6 }
  0x6c   : > { %1941 = shalt.err (!%p1938_p9)
}
  0x6d   : > { %s1942_s22 = scalar_lea.vmem %s405_s16, 16  ;;  %s1949_s19 = scalar_lea.vmem %s405_s16, 32 }
  0x6e   : > { %p1943_p10 = scmp.ne.s32.totalorder %s405_s16, %s1942_s22  ;;  %p1950_p4 = scmp.lt.s32.totalorder %s405_s16, %s405_s16 }
  0x6f   : > { %p1951_p7 = scmp.lt.s32.totalorder %s1949_s19, %s1942_s22 }
  0x70   : > { %p1945_p2 = pnand %p1943_p10, %p2264_p0 }
  0x71   : > { %p1952_p8 = por %p1951_p7, %p1950_p4 }
  0x72   : > { %p1946_p3 = pneg %p1945_p2 }
  0x74   : > { %p1953_p11 = pnand %p1952_p8, %p1946_p3 }
  0x76   : > { %1956 = shalt.err (!%p1953_p11)
}
  0x77   : > { %1734 = dma.hbm_to_vmem [thread:$0]  (!%p2248_p12), %s2594_s5, 16, %s405_s16, [#allocation7]  }
  0x78   : > { %s1957_s29 = scalar_lea.hbm %s2597_s8, 16 }
  0x79   : > { %p1958_p13 = scmp.ne.s32.totalorder %s2597_s8, %s1957_s29  ;;  %p1964_p5 = scmp.lt.u32.totalorder %s1957_s29, %s2597_s8 }
  0x7b   : > { %p1960_p1 = pnand %p1958_p13, %p2264_p0 }
  0x7d   : > { %p1961_p6 = pneg %p1960_p1 }
  0x7f   : > { %p1966_p9 = pnand %p1964_p5, %p1961_p6 }
  0x81   : > { %1969 = shalt.err (!%p1966_p9)
}
  0x82   : > { %s1970_s22 = scalar_lea.vmem %s430_s21, 16  ;;  %s1977_s16 = scalar_lea.vmem %s430_s21, 32 }
  0x83   : > { %p1971_p10 = scmp.ne.s32.totalorder %s430_s21, %s1970_s22  ;;  %p1978_p4 = scmp.lt.s32.totalorder %s430_s21, %s430_s21 }
  0x84   : > { %p1979_p7 = scmp.lt.s32.totalorder %s1977_s16, %s1970_s22 }
  0x85   : > { %p1973_p2 = pnand %p1971_p10, %p2264_p0 }
  0x86   : > { %p1980_p8 = por %p1979_p7, %p1978_p4 }
  0x87   : > { %p1974_p3 = pneg %p1973_p2 }
  0x89   : > { %p1981_p11 = pnand %p1980_p8, %p1974_p3 }
  0x8b   : > { %1984 = shalt.err (!%p1981_p11)
}
  0x8c   : > { %1740 = dma.hbm_to_vmem [thread:$0]  (!%p2248_p12), %s2597_s8, 16, %s430_s21, [#allocation10]  }
  0x8d   : > { %s2098_s26 = smov [#allocation12]   ;;  %s1985_s27 = scalar_lea.hbm %s2598_s9, 16 }
  0x8e   : > { %s440_s3 = sshll.u32 %s2098_s26, 4  ;;  %p1986_p13 = scmp.ne.s32.totalorder %s2598_s9, %s1985_s27  ;;  %s441_s3 = int_to_ptr.vmem [resolvable:$true] %s440_s3 }
  0x8f   : > { %p1992_p5 = scmp.lt.u32.totalorder %s1985_s27, %s2598_s9 }
  0x90   : > { %p1988_p1 = pnand %p1986_p13, %p2264_p0 }
  0x92   : > { %p1989_p6 = pneg %p1988_p1 }
  0x94   : > { %p1994_p9 = pnand %p1992_p5, %p1989_p6 }
  0x96   : > { %1997 = shalt.err (!%p1994_p9)
}
  0x97   : > { %s1998_s21 = scalar_lea.vmem %s441_s3, 16  ;;  %s2005_s16 = scalar_lea.vmem %s441_s3, 32 }
  0x98   : > { %p1999_p10 = scmp.ne.s32.totalorder %s441_s3, %s1998_s21  ;;  %p2006_p4 = scmp.lt.s32.totalorder %s441_s3, %s441_s3 }
  0x99   : > { %p2007_p7 = scmp.lt.s32.totalorder %s2005_s16, %s1998_s21 }
  0x9a   : > { %p2001_p2 = pnand %p1999_p10, %p2264_p0 }
  0x9b   : > { %p2008_p8 = por %p2007_p7, %p2006_p4 }
  0x9c   : > { %p2002_p3 = pneg %p2001_p2 }
  0x9e   : > { %p2009_p11 = pnand %p2008_p8, %p2002_p3 }
  0xa0   : > { %2012 = shalt.err (!%p2009_p11)
}
  0xa1   : > { %1743 = dma.hbm_to_vmem [thread:$0]  (!%p2248_p12), %s2598_s9, 16, %s441_s3, [#allocation13]  }
  0xa2   : > { %p2631_p13 = scmp.ne.s32.totalorder %s2627_s25, 0 }
  0xa3   : > { %p2632_p1 = scmp.eq.s32.totalorder (!%p2631_p13), %s2212_s17, 0 }
  0xa4   : > { %478 = sbr.rel (%p2631_p13) target bundleno = 2750 (0xabe), region = 76 }
  0xab   : > { %2058 = dma.done.wait (%p2632_p1), [#allocation4], 16   ;;  %p2633_p0 = pmov %p2632_p1 }
  0xad   : > { %2060 = vsyncadd (%p2633_p0), [#allocation4], 4294967280  ;;  %p2634_p6 = pmov %p2633_p0 }
  0xae   : > { %p2635_p5 = pmov %p2633_p0 }
  0xaf   : > { %2062 = dma.done.wait (%p2634_p6), [#allocation7], 32  }
  0xb0   : > { %2064 = vsyncadd (%p2635_p5), [#allocation7], 4294967264  ;;  %p2636_p9 = pmov %p2633_p0 }
  0xb1   : > { %p2637_p12 = pmov %p2633_p0 }
  0xb2   : > { %2066 = dma.done.wait (%p2636_p9), [#allocation10], 32  }
  0xb3   : > { %2068 = vsyncadd (%p2637_p12), [#allocation10], 4294967264  ;;  %p2638_p10 = pmov %p2633_p0 }
  0xb4   : > { %p2639_p2 = pmov %p2633_p0 }
  0xb5   : > { %2070 = dma.done.wait (%p2638_p10), [#allocation13], 16  }
  0xb6   : > { %2072 = vsyncadd (%p2639_p2), [#allocation13], 4294967280  ;;  %p546_p3 = scmp.lt.s32.totalorder %s2212_s17, 1  ;;  %vm557_vm0 = vcmask 261120   ;;  %v1815_v7 = vld [vmem:[%s2593_s4] sm:$0xff]   ;;  %v2099_v8 = vmov 0.0   ;;  %v658_v38 = vlaneseq }
  0xb7   : > { %1615 = vmatprep.subr.bf16.mxu0 %v2099_v8  ;;  %vm2100_vm1 = vmmov 0   ;;  %v1816_v9 = vld [vmem:[%s2593_s4 + $0x8] sm:$0xff]   ;;  %1623 = vmatprep.subr.bf16.mxu1 %v2099_v8  ;;  %v1545_v14 = vld [vmem:[#allocation3] ss:$0 sm:$0xff]  ;;  %v1546_v16 = vld [vmem:[#allocation6] ss:$0 sm:$0xff] }
  0xb8   : > { %s2402_s25 = scalar_select %p546_p3, %s2212_s17, 1  ;;  %1619 = vmatprep.mubr.msk.bf16.mxu0 %vm2100_vm1, %v2099_v8  ;;  %1616 = vmatpush3.bf16.msra.mxu0 %v1815_v7  ;;  %v1547_v20 = vld [vmem:[#allocation8] ss:$0 sm:$0xff]  ;;  %vm666_vm2 = vcmask 64512   ;;  %v659_v40 = vshrl.u32 %v658_v38, 7  ;;  %vm730_vm4 = vcmask 1043456  }
  0xb9   : > { %1617 = vmatprep.subr.bf16.mxu0 %v2099_v8  ;;  %1625 = vmatprep.mubr.msk.bf16.mxu1 %vm2100_vm1, %v2099_v8  ;;  %s2101_s14 = smov 120   ;;  %s2102_s23 = smov 96   ;;  %vm775_vm5 = vcmask 60416   ;;  %vm894_vm6 = vcmask 126016   ;;  %vm1013_vm7 = vcmask 191616   ;;  %vm1132_vm8 = vcmask 257216  }
  0xba   : > { %s1544_s20 = sshll.u32 %s2402_s25, 3  ;;  %s2103_s22 = smov 88   ;;  %v660_v41 = vsub.s32 0, %v659_v40  ;;  %vm1339_vm9 = vcmask 523264  }
  0xbb   : > { %s549_s3 = scalar_lea.vmem %s2589_s0, %s1544_s20  ;;  %s2104_s21 = smov 80  }
  0xbc   : > { %v2408_v0 = vld [vmem:[%s549_s3] sm:$0xff]  ;;  %1618 = vmatpush3.bf16.msra.mxu0 %v1816_v9  ;;  %s2105_s16 = smov 112   ;;  %s2106_s19 = smov 72  }
  0xbd   : > { %v558_v1 = vsel %vm557_vm0, %v2408_v0, 0.0  ;;  %1629 = vmatprep.subr.bf16.mxu0 %v2099_v8  ;;  %s2107_s24 = smov 104   ;;  %s552_s26 = scalar_lea.vmem %s2590_s1, %s2402_s25 }
  0xbe   : > { %559 = vadd.xlane.f32.xlu0 %v558_v1  ;;  %v654_v39 = vld [vmem:[%s552_s26] sm:$0x1]  ;;  %s2108_s25 = smov 64   ;;  %s2109_s3 = smov 56  }
  0xbf   : > { %vm655_vm3 = vcmp.eq.f32.partialorder %v654_v39, 0.0  ;;  %s2110_s15 = smov 48   ;;  %s2111_s29 = smov 40  }
  0xc0   : > { %v656_v42 = vsel %vm655_vm3, -1e+09, %v2099_v8  ;;  %s2112_s27 = smov 8   ;;  %s2640_s20 = sld [smem:[#allocation25_spill]] }
  0xc1   : > { %v661_v43 = vrot.slane %v656_v42, %v660_v41  ;;  %s1579_s28 = sshll.u32 %s2212_s17, 7 }
  0xc6   : > { %p2643_p7 = scmp.ne.s32.totalorder %s2640_s20, 0 }
 0x14b   : > { %v560_v2 = vpop.xlane.xlu0 %559 }
 0x14c   : > { %v562_v3 = vmul.f32 0.03125, %v560_v2 }
 0x14e   : > { %v563_v4 = vsub.f32 %v2408_v0, %v562_v3 }
 0x150   : > { %v564_v5 = vmul.f32 %v563_v4, %v563_v4 }
 0x152   : > { %v565_v6 = vsel %vm557_vm0, %v564_v5, 0.0 }
 0x153   : > { %566 = vadd.xlane.f32.xlu0 %v565_v6 }
 0x1e0   : > { %v567_v10 = vpop.xlane.xlu0 %566 }
 0x1e1   : > { %v568_v11 = vmul.f32 0.03125, %v567_v10 }
 0x1e3   : > { %v569_v12 = vadd.f32 1e-05, %v568_v11 }
 0x1e5   : > { %1825 = vrsqrt.f32 %v569_v12 }
 0x1ef   : > { %v1826_v13 = vpop.eup %1825 }
 0x1f0   : > { %v571_v15 = vmul.f32 %v1826_v13, %v563_v4 }
 0x1f2   : > { %v578_v17 = vmul.f32 %v1545_v14, %v571_v15 }
 0x1f4   : > { %v585_v18 = vadd.f32 %v1546_v16, %v578_v17 }
 0x1f6   : > { %v586_v19 = vpack.c.bf16 %v585_v18, %v585_v18 }
 0x1f8   : > { %1620 = vmatmul.mubr.msk.bf16.vlgmr.msra.gmra.mrb[0].mxu0 %vm557_vm0, %v586_v19 }
 0x1f9   : > { %1631 = vmatprep.mubr.msk.bf16.mxu0 %vm2100_vm1, %v2099_v8 }
 0x2cb   : > { %v647_v21 = vpop.f32.mrb[0].mxu0 }
 0x2cc   : > { %v648_v22 = vadd.f32 %v1547_v20, %v647_v21  ;;  %v1621_v23 = vpop.f32.mrb[1].mxu0 }
 0x2cd   : > { %v650_v24 = vpop.f32.mrb[2].mxu0 }
 0x2ce   : > { %v2431_v25 = vpack.c.bf16 %v648_v22, %v648_v22  ;;  %v1622_v26 = vpop.f32.mrb[3].mxu0 }
 0x2d0   : > { %777 = vrot.lane.b32.xlu0 %v2431_v25, %s2101_s14  ;;  %664 = vrot.lane.b32.xlu1 %v2431_v25, %s2102_s23  ;;  %s2115_s23 = smov [#allocation14]  }
 0x2d4   : > { %779 = vrot.lane.b32.xlu1 %v2431_v25, %s2103_s22  ;;  %s2017_s22 = sshll.u32 %s2115_s23, 4  ;;  %s2018_s22 = int_to_ptr.vmem [resolvable:$false] %s2017_s22 }
 0x2d8   : > { %898 = vrot.lane.b32.xlu1 %v2431_v25, %s2104_s21  ;;  %s2113_s21 = smov 16  }
 0x2dc   : > { %896 = vrot.lane.b32.xlu1 %v2431_v25, %s2105_s16  ;;  %s2114_s16 = smov 24  }
 0x2e0   : > { %1017 = vrot.lane.b32.xlu1 %v2431_v25, %s2106_s19 }
 0x2e4   : > { %1015 = vrot.lane.b32.xlu1 %v2431_v25, %s2107_s24 }
 0x342   : > { %v665_v27 = vpop.permute.xlu1 %664  ;;  %v778_v32 = vpop.permute.xlu0 %777 }
 0x343   : > { %v671_v28 = vsel %vm666_vm2, %v665_v27, 0 }
 0x344   : > { %1624 = vmatpush3.bf16.xpose.msra.mxu1 %v671_v28 }
 0x345   : > { %1635 = vmatprep.subr.bf16.mxu1 %v2099_v8 }
 0x346   : > { %v780_v29 = vpop.permute.xlu1 %779 }
 0x347   : > { %v785_v30 = vsel %vm666_vm2, %v780_v29, 0 }
 0x34a   : > { %v899_v31 = vpop.permute.xlu1 %898 }
 0x34b   : > { %1626 = vmatmul.mubr.msk.bf16.vlgmr.msra.gmra.mrb[0].mxu1 %vm666_vm2, %v2431_v25  ;;  %v904_v34 = vsel %vm666_vm2, %v899_v31, 0 }
 0x34c   : > { %1636 = vmatpush3.bf16.xpose.msra.mxu1 %v785_v30  ;;  %1637 = vmatprep.mubr.msk.bf16.mxu1 %vm2100_vm1, %v2099_v8 }
 0x34d   : > { %1647 = vmatprep.subr.bf16.mxu1 %v2099_v8 }
 0x34e   : > { %v897_v33 = vpop.permute.xlu1 %896 }
 0x352   : > { %v1018_v35 = vpop.permute.xlu1 %1017 }
 0x353   : > { %1638 = vmatmul.mubr.msk.bf16.vlgmr.msra.gmra.mrb[4].mxu1 %vm666_vm2, %v778_v32  ;;  %v1023_v36 = vsel %vm666_vm2, %v1018_v35, 0 }
 0x354   : > { %1648 = vmatpush3.bf16.xpose.msra.mxu1 %v904_v34  ;;  %1649 = vmatprep.mubr.msk.bf16.mxu1 %vm2100_vm1, %v2099_v8 }
 0x355   : > { %1659 = vmatprep.subr.bf16.mxu1 %v2099_v8 }
 0x356   : > { %v1016_v37 = vpop.permute.xlu1 %1015 }
 0x35b   : > { %1650 = vmatmul.mubr.msk.bf16.vlgmr.msra.gmra.mrb[8].mxu1 %vm666_vm2, %v897_v33 }
 0x35c   : > { %1660 = vmatpush3.bf16.xpose.msra.mxu1 %v1023_v36  ;;  %1661 = vmatprep.mubr.msk.bf16.mxu1 %vm2100_vm1, %v2099_v8 }
 0x35d   : > { %1671 = vmatprep.subr.bf16.mxu1 %v2099_v8 }
 0x363   : > { %1662 = vmatmul.mubr.msk.bf16.vlgmr.msra.gmra.mrb[12].mxu1 %vm666_vm2, %v1016_v37 }
 0x364   : > { %1675 = vmatprep.mubr.msk.bf16.mxu1 %vm2100_vm1, %v2099_v8 }
 0x41e   : > { %v707_v44 = vpop.f32.mrb[0].mxu1 }
 0x41f   : > { %v708_v45 = vadd.f32 %v707_v44, %v661_v43  ;;  %v1627_v46 = vpop.f32.mrb[1].mxu1 }
 0x420   : > { %v710_v47 = vpop.f32.mrb[2].mxu1 }
 0x421   : > { %v1628_v48 = vpop.f32.mrb[3].mxu1  ;;  %v713_v49 = vsel %vm666_vm2, %v708_v45, -inf }
 0x422   : > { %714 = vmax.xlane.f32.xlu1 %v713_v49 }
 0x426   : > { %v821_v50 = vpop.f32.mrb[4].mxu1 }
 0x427   : > { %v822_v51 = vadd.f32 %v821_v50, %v661_v43  ;;  %v1639_v52 = vpop.f32.mrb[5].mxu1 }
 0x428   : > { %v824_v53 = vpop.f32.mrb[6].mxu1 }
 0x429   : > { %v1640_v54 = vpop.f32.mrb[7].mxu1  ;;  %v827_v55 = vsel %vm666_vm2, %v822_v51, -inf }
 0x42a   : > { %828 = vmax.xlane.f32.xlu0 %v827_v55 }
 0x42e   : > { %v940_v56 = vpop.f32.mrb[8].mxu1 }
 0x42f   : > { %v941_v57 = vadd.f32 %v940_v56, %v661_v43  ;;  %v1651_v58 = vpop.f32.mrb[9].mxu1 }
 0x430   : > { %v943_v59 = vpop.f32.mrb[10].mxu1 }
 0x431   : > { %v1652_v60 = vpop.f32.mrb[11].mxu1  ;;  %v946_v61 = vsel %vm666_vm2, %v941_v57, -inf }
 0x432   : > { %947 = vmax.xlane.f32.xlu1 %v946_v61  ;;  %v1817_v60 = vld [vmem:[%s2595_s6] sm:$0xff]  }
 0x433   : > { %1672 = vmatpush3.bf16.msra.mxu1 %v1817_v60 }
 0x434   : > { %1673 = vmatprep.subr.bf16.mxu1 %v2099_v8 }
 0x436   : > { %v1059_v62 = vpop.f32.mrb[12].mxu1 }
 0x437   : > { %v1060_v63 = vadd.f32 %v1059_v62, %v661_v43  ;;  %v1663_v1 = vpop.f32.mrb[13].mxu1  ;;  %v1818_v62 = vld [vmem:[%s2595_s6 + $0x8] sm:$0xff]  }
 0x438   : > { %v1062_v2 = vpop.f32.mrb[14].mxu1  ;;  %1674 = vmatpush3.bf16.msra.mxu1 %v1818_v62 }
 0x439   : > { %v1664_v3 = vpop.f32.mrb[15].mxu1  ;;  %v1065_v4 = vsel %vm666_vm2, %v1060_v63, -inf  ;;  %1687 = vmatprep.subr.bf16.mxu1 %v2099_v8 }
 0x43a   : > { %1066 = vmax.xlane.f32.xlu0 %v1065_v4 }
 0x4af   : > { %v715_v5 = vpop.xlane.xlu1 %714 }
 0x4b0   : > { %v716_v6 = vsub.f32 %v708_v45, %v715_v5 }
 0x4b2   : > { %v717_v7 = vmul.f32 1.442695, %v716_v6 }
 0x4b4   : > { %1827 = vpow2.f32 %v717_v7 }
 0x4b7   : > { %v829_v9 = vpop.xlane.xlu0 %828 }
 0x4b8   : > { %v830_v10 = vsub.f32 %v822_v51, %v829_v9 }
 0x4ba   : > { %v831_v11 = vmul.f32 1.442695, %v830_v10 }
 0x4bc   : > { %1829 = vpow2.f32 %v831_v11 }
 0x4be   : > { %v1828_v12 = vpop.eup %1827 }
 0x4bf   : > { %v719_v13 = vsel %vm666_vm2, %v1828_v12, 0.0  ;;  %v948_v21 = vpop.xlane.xlu1 %947 }
 0x4c0   : > { %720 = vadd.xlane.f32.xlu1 %v719_v13  ;;  %v949_v22 = vsub.f32 %v941_v57, %v948_v21 }
 0x4c2   : > { %v950_v23 = vmul.f32 1.442695, %v949_v22 }
 0x4c6   : > { %v1830_v14 = vpop.eup %1829 }
 0x4c7   : > { %v1067_v15 = vpop.xlane.xlu0 %1066  ;;  %v833_v16 = vsel %vm666_vm2, %v1830_v14, 0.0 }
 0x4c8   : > { %v1068_v17 = vsub.f32 %v1060_v63, %v1067_v15  ;;  %834 = vadd.xlane.f32.xlu0 %v833_v16 }
 0x4ca   : > { %v1069_v18 = vmul.f32 1.442695, %v1068_v17 }
 0x4cc   : > { %1831 = vpow2.f32 %v1069_v18 }
 0x4cd   : > { %1833 = vpow2.f32 %v950_v23 }
 0x4d1   : > { %725 = vrot.lane.b32.xlu1 %v2431_v25, %s2108_s25 }
 0x4d6   : > { %v1832_v19 = vpop.eup %1831 }
 0x4d7   : > { %v1071_v20 = vsel %vm666_vm2, %v1832_v19, 0.0  ;;  %v1834_v24 = vpop.eup %1833 }
 0x4d8   : > { %1072 = vadd.xlane.f32.xlu0 %v1071_v20  ;;  %v952_v26 = vsel %vm666_vm2, %v1834_v24, 0.0 }
 0x4ee   : > { %839 = vrot.lane.b32.xlu0 %v2431_v25, %s2109_s3 }
 0x4f5   : > { %953 = vadd.xlane.f32.xlu1 %v952_v26 }
 0x506   : > { %958 = vrot.lane.b32.xlu1 %v2431_v25, %s2110_s15 }
 0x50a   : > { %1077 = vrot.lane.b32.xlu1 %v2431_v25, %s2111_s29  ;;  %s2641_s29 = sld [smem:[#allocation28_spill]] }
 0x510   : > { %s2546_s18 = scalar_lea.hbm %s2641_s29, %s1579_s28 }
 0x54d   : > { %v721_v27 = vpop.xlane.xlu1 %720 }
 0x54e   : > { %1835 = vrcp.f32 %v721_v27 }
 0x551   : > { %v726_v28 = vpop.permute.xlu1 %725 }
 0x552   : > { %v732_v29 = vsel %vm730_vm4, %v726_v28, 0  ;;  %v1819_v28 = vld [vmem:[%s2599_s10] sm:$0xff]  }
 0x553   : > { %1630 = vmatpush3.bf16.msra.mxu0 %v732_v29  ;;  %v1821_v29 = vld [vmem:[%s2601_s12] sm:$0xff]  }
 0x554   : > { %1641 = vmatprep.subr.bf16.mxu0 %v2099_v8 }
 0x555   : > { %v835_v31 = vpop.xlane.xlu0 %834 }
 0x556   : > { %1837 = vrcp.f32 %v835_v31 }
 0x558   : > { %v1836_v30 = vpop.eup %1835 }
 0x559   : > { %v723_v32 = vmul.f32 %v1836_v30, %v1828_v12  ;;  %v1822_v30 = vld [vmem:[%s2601_s12 + $0x8] sm:$0xff]  }
 0x55b   : > { %v724_v33 = vpack.c.bf16 %v723_v32, %v723_v32 }
 0x55d   : > { %1632 = vmatmul.mubr.msk.bf16.vlgmr.msra.gmra.mrb[4].mxu0 %vm666_vm2, %v724_v33 }
 0x55e   : > { %1643 = vmatprep.mubr.msk.bf16.mxu0 %vm2100_vm1, %v2099_v8 }
 0x560   : > { %v1838_v25 = vpop.eup %1837 }
 0x561   : > { %v837_v35 = vmul.f32 %v1838_v25, %v1830_v14  ;;  %v1562_v14 = vld [vmem:[#allocation9] ss:$0 sm:$0xff] }
 0x563   : > { %v838_v38 = vpack.c.bf16 %v837_v35, %v837_v35 }
 0x565   : > { %v1073_v34 = vpop.xlane.xlu0 %1072 }
 0x569   : > { %v840_v36 = vpop.permute.xlu0 %839 }
 0x56a   : > { %v845_v37 = vsel %vm730_vm4, %v840_v36, 0  ;;  %v1567_v36 = vld [vmem:[#allocation12] ss:$0 sm:$0xff] }
 0x56b   : > { %1642 = vmatpush3.bf16.msra.mxu0 %v845_v37 }
 0x56c   : > { %1653 = vmatprep.subr.bf16.mxu0 %v2099_v8 }
 0x56e   : > { %1644 = vmatmul.mubr.msk.bf16.vlgmr.msra.gmra.mrb[8].mxu0 %vm666_vm2, %v838_v38 }
 0x56f   : > { %1655 = vmatprep.mubr.msk.bf16.mxu0 %vm2100_vm1, %v2099_v8 }
 0x582   : > { %v954_v39 = vpop.xlane.xlu1 %953 }
 0x583   : > { %1839 = vrcp.f32 %v954_v39 }
 0x584   : > { %1841 = vrcp.f32 %v1073_v34  ;;  %v1566_v34 = vld [vmem:[#allocation11] ss:$0 sm:$0xff] }
 0x586   : > { %v959_v40 = vpop.permute.xlu1 %958 }
 0x587   : > { %v964_v41 = vsel %vm730_vm4, %v959_v40, 0  ;;  %v1823_v40 = vld [vmem:[%s2601_s12 + $0x10] sm:$0xff]  }
 0x588   : > { %1654 = vmatpush3.bf16.msra.mxu0 %v964_v41  ;;  %v1824_v41 = vld [vmem:[%s2601_s12 + $0x18] sm:$0xff]  }
 0x589   : > { %1665 = vmatprep.subr.bf16.mxu0 %v2099_v8 }
 0x58a   : > { %v1078_v44 = vpop.permute.xlu1 %1077 }
 0x58b   : > { %v1083_v47 = vsel %vm730_vm4, %v1078_v44, 0 }
 0x58d   : > { %v1840_v42 = vpop.eup %1839 }
 0x58e   : > { %v956_v43 = vmul.f32 %v1840_v42, %v1834_v24  ;;  %v1842_v46 = vpop.eup %1841  ;;  %v1568_v42 = vld [vmem:[%s2600_s11] ss:$0 sm:$0xff] }
 0x58f   : > { %v1075_v48 = vmul.f32 %v1842_v46, %v1832_v19 }
 0x590   : > { %v957_v45 = vpack.c.bf16 %v956_v43, %v956_v43 }
 0x591   : > { %v1076_v49 = vpack.c.bf16 %v1075_v48, %v1075_v48 }
 0x592   : > { %1656 = vmatmul.mubr.msk.bf16.vlgmr.msra.gmra.mrb[12].mxu0 %vm666_vm2, %v957_v45 }
 0x593   : > { %1666 = vmatpush3.bf16.msra.mxu0 %v1083_v47  ;;  %1667 = vmatprep.mubr.msk.bf16.mxu0 %vm2100_vm1, %v2099_v8 }
 0x594   : > { %1679 = vmatprep.subr.bf16.mxu0 %v2099_v8 }
 0x59a   : > { %1668 = vmatmul.mubr.msk.bf16.vlgmr.msra.gmra.mrb[16].mxu0 %vm666_vm2, %v1076_v49 }
 0x59b   : > { %1683 = vmatprep.mubr.msk.bf16.mxu0 %vm2100_vm1, %v2099_v8  ;;  %1680 = vmatpush3.bf16.msra.mxu0 %v1819_v28 }
 0x59c   : > { %1681 = vmatprep.subr.bf16.mxu0 %v2099_v8 }
 0x630   : > { %v768_v50 = vpop.f32.mrb[4].mxu0 }
 0x631   : > { %v774_v51 = vpack.c.bf16 %v768_v50, %v768_v50  ;;  %v1633_v52 = vpop.f32.mrb[5].mxu0 }
 0x632   : > { %v771_v53 = vpop.f32.mrb[6].mxu0 }
 0x633   : > { %776 = vst.msk [vmem:[#allocation2] sm:$0xf] %vm775_vm5, %v774_v51  ;;  %v1634_v54 = vpop.f32.mrb[7].mxu0 }
 0x641   : > { %v881_v55 = vpop.f32.mrb[8].mxu0 }
 0x642   : > { %v1582_v56 = vpack.c.bf16 %v881_v55, %v881_v55  ;;  %v1645_v57 = vpop.f32.mrb[9].mxu0 }
 0x643   : > { %v884_v58 = vpop.f32.mrb[10].mxu0 }
 0x644   : > { %891 = vrot.lane.b32.xlu0 %v1582_v56, %s2112_s27  ;;  %v1646_v59 = vpop.f32.mrb[11].mxu0  ;;  %s2642_s27 = smov %s2641_s29 }
 0x665   : > { %v1000_v61 = vpop.f32.mrb[12].mxu0 }
 0x666   : > { %v1583_v63 = vpack.c.bf16 %v1000_v61, %v1000_v61  ;;  %v1657_v1 = vpop.f32.mrb[13].mxu0 }
 0x667   : > { %v1003_v2 = vpop.f32.mrb[14].mxu0 }
 0x668   : > { %1010 = vrot.lane.b32.xlu1 %v1583_v63, %s2113_s21  ;;  %v1658_v3 = vpop.f32.mrb[15].mxu0  ;;  %s543_s21 = sand.u32 1, %s2083_s30  }
 0x669   : > { %s1386_s17 = scalar_lea.sflag [#allocation5], %s543_s21 }
 0x66d   : > { %v1119_v4 = vpop.f32.mrb[16].mxu0 }
 0x66e   : > { %v1584_v5 = vpack.c.bf16 %v1119_v4, %v1119_v4  ;;  %v1669_v6 = vpop.f32.mrb[17].mxu0 }
 0x66f   : > { %v1122_v7 = vpop.f32.mrb[18].mxu0 }
 0x670   : > { %1129 = vrot.lane.b32.xlu0 %v1584_v5, %s2114_s16  ;;  %v1670_v9 = vpop.f32.mrb[19].mxu0  ;;  %s1543_s16 = sshll.u32 %s543_s21, 3 }
 0x671   : > { %s545_s26 = scalar_lea.vmem [#allocation14], %s1543_s16  ;;  %s2019_s16 = scalar_lea.vmem %s2018_s22, 256 }
 0x672   : > { %s1399_s25 = sshll.u32 %s545_s26, 4  ;;  %s2548_s25 = int_to_ptr.vmem [resolvable:$true] %s1399_s25 }
 0x673   : > { %s2013_s14 = scalar_lea.vmem %s2548_s25, 128  ;;  %p2020_p13 = scmp.lt.s32.totalorder %s2548_s25, %s2018_s22 }
 0x674   : > { %p2014_p4 = scmp.ne.s32.totalorder %s2548_s25, %s2013_s14  ;;  %p2021_p1 = scmp.lt.s32.totalorder %s2019_s16, %s2013_s14 }
 0x676   : > { %p2015_p8 = pnand %p2014_p4, %p2643_p7  ;;  %p2022_p0 = por %p2021_p1, %p2020_p13 }
 0x678   : > { %p2016_p11 = pneg %p2015_p8 }
 0x67a   : > { %p2023_p6 = pnand %p2022_p0, %p2016_p11 }
 0x6b6   : > { %v892_v10 = vpop.permute.xlu0 %891 }
 0x6b7   : > { %895 = vst.msk [vmem:[#allocation2] sm:$0xf] %vm894_vm6, %v892_v10 }
 0x6da   : > { %v1011_v11 = vpop.permute.xlu1 %1010 }
 0x6db   : > { %1014 = vst.msk [vmem:[#allocation2] sm:$0xf] %vm1013_vm7, %v1011_v11 }
 0x6e2   : > { %v1130_v12 = vpop.permute.xlu0 %1129 }
 0x6e3   : > { %1133 = vst.msk [vmem:[#allocation2] sm:$0xf] %vm1132_vm8, %v1130_v12 }
 0x6ea   : > { %v1134_v13 = vld [vmem:[#allocation2] sm:$0xf] }
 0x6eb   : > { %1676 = vmatmul.mubr.msk.bf16.vlgmr.msra.gmra.mrb[16].mxu1 %vm557_vm0, %v1134_v13 }
 0x6ec   : > { %1695 = vmatprep.mubr.msk.bf16.mxu1 %vm2100_vm1, %v2099_v8  ;;  %1688 = vmatpush3.bf16.msra.mxu1 %v1821_v29 }
 0x6ed   : > { %1689 = vmatprep.subr.bf16.mxu1 %v2099_v8 }
 0x6f0   : > { %1690 = vmatpush3.bf16.msra.mxu1 %v1822_v30 }
 0x6f1   : > { %1691 = vmatprep.subr.bf16.mxu1 %v2099_v8 }
 0x6f4   : > { %1692 = vmatpush3.bf16.msra.mxu1 %v1823_v40 }
 0x6f5   : > { %1693 = vmatprep.subr.bf16.mxu1 %v2099_v8  ;;  %v1572_v8 = vld [vmem:[%s2602_s13] ss:$0 sm:$0xff] }
 0x6f8   : > { %1694 = vmatpush3.bf16.msra.mxu1 %v1824_v41 }
 0x7be   : > { %v1195_v15 = vpop.f32.mrb[16].mxu1 }
 0x7bf   : > { %v1196_v16 = vadd.f32 %v1562_v14, %v1195_v15  ;;  %v1677_v17 = vpop.f32.mrb[17].mxu1 }
 0x7c0   : > { %v1198_v18 = vpop.f32.mrb[18].mxu1 }
 0x7c1   : > { %v1201_v19 = vadd.f32 %v1196_v16, %v2408_v0  ;;  %v1678_v20 = vpop.f32.mrb[19].mxu1  ;;  %v1820_v0 = vld [vmem:[%s2599_s10 + $0x8] sm:$0xff]  }
 0x7c2   : > { %1682 = vmatpush3.bf16.msra.mxu0 %v1820_v0 }
 0x7c3   : > { %v1204_v21 = vsel %vm557_vm0, %v1201_v19, 0.0 }
 0x7c4   : > { %1205 = vadd.xlane.f32.xlu1 %v1204_v21 }
 0x851   : > { %v1206_v22 = vpop.xlane.xlu1 %1205 }
 0x852   : > { %v1207_v23 = vmul.f32 0.03125, %v1206_v22 }
 0x854   : > { %v1208_v24 = vsub.f32 %v1201_v19, %v1207_v23 }
 0x856   : > { %v1209_v26 = vmul.f32 %v1208_v24, %v1208_v24 }
 0x858   : > { %v1210_v27 = vsel %vm557_vm0, %v1209_v26, 0.0 }
 0x859   : > { %1211 = vadd.xlane.f32.xlu0 %v1210_v27 }
 0x8e6   : > { %v1212_v31 = vpop.xlane.xlu0 %1211 }
 0x8e7   : > { %v1213_v32 = vmul.f32 0.03125, %v1212_v31 }
 0x8e9   : > { %v1214_v33 = vadd.f32 1e-05, %v1213_v32 }
 0x8eb   : > { %1843 = vrsqrt.f32 %v1214_v33 }
 0x8f5   : > { %v1844_v25 = vpop.eup %1843 }
 0x8f6   : > { %v1216_v35 = vmul.f32 %v1844_v25, %v1208_v24 }
 0x8f8   : > { %v1223_v37 = vmul.f32 %v1566_v34, %v1216_v35 }
 0x8fa   : > { %v1230_v38 = vadd.f32 %v1567_v36, %v1223_v37 }
 0x8fc   : > { %v1231_v39 = vpack.c.bf16 %v1230_v38, %v1230_v38 }
 0x8fe   : > { %1684 = vmatmul.mubr.msk.bf16.vlgmr.msra.gmra.mrb[20].mxu0 %vm557_vm0, %v1231_v39 }
 0x9d1   : > { %v1292_v43 = vpop.f32.mrb[20].mxu0 }
 0x9d2   : > { %v1293_v44 = vadd.f32 %v1568_v42, %v1292_v43  ;;  %v1685_v45 = vpop.f32.mrb[21].mxu0 }
 0x9d3   : > { %v1295_v46 = vpop.f32.mrb[22].mxu0 }
 0x9d4   : > { %v1298_v47 = vmax.f32 %v1293_v44, 0.0  ;;  %v1686_v48 = vpop.f32.mrb[23].mxu0 }
 0x9d6   : > { %v1299_v49 = vpack.c.bf16 %v1298_v47, %v1298_v47 }
 0x9d8   : > { %1696 = vmatmul.mubr.msk.bf16.vlgmr.msra.gmra.mrb[20].mxu1 %vm1339_vm9, %v1299_v49 }
 0xaab   : > { %v1377_v50 = vpop.f32.mrb[20].mxu1 }
 0xaac   : > { %v1378_v51 = vadd.f32 %v1572_v8, %v1377_v50  ;;  %v1697_v52 = vpop.f32.mrb[21].mxu1 }
 0xaad   : > { %v1380_v53 = vpop.f32.mrb[22].mxu1 }
 0xaae   : > { %v1383_v54 = vadd.f32 %v1378_v51, %v1201_v19  ;;  %v1698_v55 = vpop.f32.mrb[23].mxu1 }
 0xab0   : > { %1384 = vst.msk [vmem:[%s545_s26] sm:$0xff] %vm557_vm0, %v1383_v54 }
 0xab1   : > { %2026 = shalt.err (!%p2023_p6)
}
 0xab2   : > { %s2027_s21 = scalar_lea.hbm %s2546_s18, 128  ;;  %s2031_s28 = scalar_lea.hbm %s2642_s27, 256 }
 0xab3   : > { %p2028_p5 = scmp.ne.s32.totalorder %s2546_s18, %s2027_s21  ;;  %p2032_p10 = scmp.lt.u32.totalorder %s2546_s18, %s2642_s27 }
 0xab4   : > { %p2033_p2 = scmp.lt.u32.totalorder %s2031_s28, %s2027_s21  ;;  %p2035_p4 = scmp.lt.u32.totalorder %s2027_s21, %s2546_s18 }
 0xab5   : > { %p2029_p9 = pnand %p2028_p5, %p2643_p7 }
 0xab6   : > { %p2034_p3 = por %p2033_p2, %p2032_p10 }
 0xab7   : > { %p2030_p12 = pneg %p2029_p9 }
 0xab8   : > { %p2036_p8 = por %p2035_p4, %p2034_p3 }
 0xaba   : > { %p2037_p11 = pnand %p2036_p8, %p2030_p12 }
 0xabc   : > { %2040 = shalt.err (!%p2037_p11)
}
 0xabd   : > { %1723 = dma.vmem_to_hbm [thread:$0]  (%p2643_p7), %s2548_s25, 128, %s2546_s18, %s1386_s17  }
 0xabe PF: > { %s2644_s15 = sld [smem:[#allocation22_spill]]  ;;  %s2645_s29 = sld [smem:[#allocation20_spill]] }
 0xabf   : > { %s2646_s14 = sld [smem:[#allocation26_spill]] }
 0xac4   : > { %p1760_p13 = scmp.ge.s32.totalorder %s2644_s15, 2  ;;  %s1411_s23 = sand.u32 1, %s2645_s29  }
 0xac5   : > { %p2647_p1 = scmp.ne.s32.totalorder %s2646_s14, 0  ;;  %s1412_s22 = scalar_lea.sflag [#allocation5], %s1411_s23 }
 0xac7   : > { %p1745_p0 = pnand %p1760_p13, %p2647_p1 }
 0xac9   : > { %2074 = dma.done.wait (!%p1745_p0), %s1412_s22, 128  }
 0xaca   : > { %2076 = vsyncadd (!%p1745_p0), %s1412_s22, 4294967168  ;;  %s2648_s16 = sld [smem:[#allocation23_spill]]  ;;  %s2649_s21 = sld [smem:[#allocation21_spill]] }
 0xacb   : > { %s2650_s15 = sld [smem:[#allocation24_spill]]  ;;  %s2651_s29 = smov %s2083_s30 }
 0xad0   : > { %p28_p6 = scmp.ge.s32.totalorder %s2648_s16, 4   ;;  %s2652_s30 = smov %s2649_s21 }
 0xad2   :  { %30 = sbr.rel (!%p28_p6) target bundleno = 10 (0xa), region = 139 }
 0xad9   :  { %1417 = vsyncpa [#allocation4], 1 }
 0xada   :  { %1419 = vsyncpa [#allocation4 + $0x1], 1 }
 0xadb   :  { %1420 = vsyncpa [#allocation7], 1 }
 0xadc   :  { %1421 = vsyncpa [#allocation10], 1 }
 0xadd   :  { %1422 = vsyncpa [#allocation13], 1 }
 0xade   :  { %1423 = vsyncpa [#allocation5], 1 }
 0xadf   :  { %1425 = vsyncpa [#allocation5 + $0x1], 1 }

// kernel: tpu_custom_call.1
= control target key start
LH: loop header
LB: loop body
LE: loop exit
PB: predicated region body
PF: predicated region fallthrough
CT: control target
= control target key end

     0   :  { %s2589_s0 = inlined_call_operand.vmem [shape: f32[2,8,32], index: 0, kind: input, shape index: {}]   ;;  %s2590_s1 = inlined_call_operand.vmem [shape: f32[2,1,8], index: 1, kind: input, shape index: {}]   ;;  %s2591_s2 = inlined_call_operand.hbm [shape: f32[1,32], index: 2, kind: input, shape index: {}]   ;;  %s2592_s3 = inlined_call_operand.hbm [shape: f32[1,32], index: 3, kind: input, shape index: {}]   ;;  %s2593_s4 = inlined_call_operand.vmem [shape: bf16[32,96], index: 4, kind: input, shape index: {}]   ;;  %s2594_s5 = inlined_call_operand.hbm [shape: f32[1,96], index: 5, kind: input, shape index: {}]   ;;  %s2595_s6 = inlined_call_operand.vmem [shape: bf16[32,32], index: 6, kind: input, shape index: {}]   ;;  %s2596_s7 = inlined_call_operand.hbm [shape: f32[1,32], index: 7, kind: input, shape index: {}]   ;;  %s2597_s8 = inlined_call_operand.hbm [shape: f32[1,32], index: 8, kind: input, shape index: {}]   ;;  %s2598_s9 = inlined_call_operand.hbm [shape: f32[1,32], index: 9, kind: input, shape index: {}]   ;;  %s2599_s10 = inlined_call_operand.vmem [shape: bf16[32,64], index: 10, kind: input, shape index: {}]   ;;  %s2600_s11 = inlined_call_operand.vmem [shape: f32[1,64], index: 11, kind: input, shape index: {}]   ;;  %s2601_s12 = inlined_call_operand.vmem [shape: bf16[64,32], index: 12, kind: input, shape index: {}]   ;;  %s2602_s13 = inlined_call_operand.vmem [shape: f32[1,32], index: 13, kind: input, shape index: {}]   ;;  %s2603_s14 = inlined_call_operand.hbm [shape: f32[2,8,32], index: 14, kind: output, shape index: {}]  }
   0x1   :  { %2616 = sst [smem:[#allocation27_spill]] %s2592_s3 }
   0x2   :  { %2617 = sst [smem:[#allocation28_spill]] %s2603_s14 }
   0x3   :  { %19 = vsyncpa [#allocation4], 0 }
   0x4   :  { %20 = vsyncpa [#allocation7], 0 }
   0x5   :  { %21 = vsyncpa [#allocation10], 0 }
   0x6   :  { %22 = vsyncpa [#allocation13], 0 }
   0x7   :  { %23 = vsyncpa [#allocation5], 0 }
   0x8   :  { %25 = vsyncpa [#allocation5 + $0x1], 0  ;;  %s2191_s29 = smov 0   ;;  %s2193_s30 = smov 0  }
   0x9   :  { %s2195_s15 = smov 0   ;;  %s2197_s16 = smov 0  }
   0xa LB: > { %2618 = sst [smem:[#allocation20_spill]] %s2079_s29  ;;  %s2212_s17 = sadd.s32 4294967295, %s2091_s16   ;;  %s2091_s16 = sphi %s2197_s16, %s2648_s16   ;;  %s2087_s15 = sphi %s2195_s15, %s2650_s15   ;;  %s2083_s30 = sphi %s2193_s30, %s2652_s30   ;;  %s2079_s29 = sphi %s2191_s29, %s2651_s29  }
   0xb   : > { %2619 = sst [smem:[#allocation21_spill]] %s2087_s15  ;;  %s1527_s18 = sadd.s32 4294967294, %s2091_s16  }
   0xc   : > { %2620 = sst [smem:[#allocation22_spill]] %s2091_s16  ;;  %s2216_s19 = sadd.s32 1, %s2091_s16  }
   0xd   : > { %2621 = sst [smem:[#allocation23_spill]] %s2216_s19  ;;  %s342_s20 = sadd.s32 1, %s2087_s15 }
   0xe   : > { %s339_s21 = ssub.s32 %s2091_s16, %s2216_s19  ;;  %p352_p0 = scmp.ne.s32.totalorder %s2087_s15, %s2083_s30 }
   0xf   : > { %p340_p1 = scmp.eq.s32.totalorder %s339_s21, 0  ;;  %p353_p2 = scmp.eq.s32.totalorder %s2212_s17, 1 }
  0x10   : > { %p358_p3 = scmp.ne.s32.totalorder %s2083_s30, %s2079_s29  ;;  %p359_p4 = scmp.eq.s32.totalorder %s1527_s18, 1 }
  0x11   : > { %s2227_s22 = scalar_select %p340_p1, %s2087_s15, %s342_s20  }
  0x12   : > { %p2229_p5 = por %p353_p2, %p352_p0  ;;  %p2233_p6 = por %p359_p4, %p358_p3 }
  0x13   : > { %2622 = sst [smem:[#allocation24_spill]] %s2227_s22  ;;  %p1528_p7 = scmp.ge.s32.totalorder %s2091_s16, 1 }
  0x14   : > { %s2623_s23 = scalar_select %p2229_p5, 1, 0 }
  0x15   : > { %s2625_s24 = scalar_select %p2233_p6, 1, 0 }
  0x16   : > { %2624 = sst [smem:[#allocation25_spill]] %s2623_s23  ;;  %p366_p8 = scmp.lt.s32.totalorder %s2091_s16, 3 }
  0x17   : > { %2626 = sst [smem:[#allocation26_spill]] %s2625_s24  ;;  %p2610_p9 = scmp.eq.s32.totalorder %s2212_s17, 0 }
  0x18   : > { %p2240_p10 = pnand %p1528_p7, %p366_p8  ;;  %s2093_s26 = smov [#allocation6]  }
  0x19   : > { %s390_s27 = sshll.u32 %s2093_s26, 4  ;;  %s2094_s28 = smov [#allocation9]   ;;  %s391_s27 = int_to_ptr.vmem [resolvable:$true] %s390_s27 }
  0x1a   : > { %s2627_s25 = scalar_select %p2240_p10, 1, 0 }
  0x1b   : > { %p1725_p11 = pneg %p2240_p10  ;;  %s418_s18 = sshll.u32 %s2094_s28, 4  ;;  %s2252_s18 = int_to_ptr.vmem [resolvable:$true] %s418_s18 }
  0x1c   : > { %s2095_s21 = smov [#allocation3]   ;;  %s2629_s3 = sld [smem:[#allocation27_spill]] }
  0x1d   : > { %p2248_p12 = pnand %p2610_p9, %p1725_p11  ;;  %s379_s22 = sshll.u32 %s2095_s21, 4  ;;  %s2254_s22 = int_to_ptr.vmem [resolvable:$true] %s379_s22 }
  0x1f   : > { %p2264_p0 = pneg %p2248_p12 }
  0x22   : > { %s1845_s26 = scalar_lea.hbm %s2629_s3, 16 }
  0x23   : > { %p1846_p13 = scmp.ne.s32.totalorder %s2629_s3, %s1845_s26  ;;  %p1852_p3 = scmp.lt.u32.totalorder %s1845_s26, %s2629_s3 }
  0x25   : > { %p1848_p1 = pnand %p2264_p0, %p1846_p13 }
  0x27   : > { %p1849_p2 = pneg %p1848_p1 }
  0x29   : > { %p1854_p4 = pnand %p1852_p3, %p1849_p2 }
  0x2b   : > { %1857 = shalt.err (!%p1854_p4)
}
  0x2c   : > { %s1858_s15 = scalar_lea.vmem %s391_s27, 16  ;;  %s1865_s29 = scalar_lea.vmem %s391_s27, 32 }
  0x2d   : > { %p1859_p7 = scmp.ne.s32.totalorder %s391_s27, %s1858_s15  ;;  %p1866_p9 = scmp.lt.s32.totalorder %s391_s27, %s391_s27 }
  0x2e   : > { %p1867_p6 = scmp.lt.s32.totalorder %s1865_s29, %s1858_s15 }
  0x2f   : > { %p1861_p8 = pnand %p1859_p7, %p2264_p0 }
  0x30   : > { %p1868_p5 = por %p1867_p6, %p1866_p9 }
  0x31   : > { %p1862_p11 = pneg %p1861_p8 }
  0x33   : > { %p1869_p10 = pnand %p1868_p5, %p1862_p11 }
  0x35   : > { %1872 = shalt.err (!%p1869_p10)
}
  0x36   : > { %1731 = dma.hbm_to_vmem [thread:$0]  (!%p2248_p12), %s2629_s3, 16, %s391_s27, [#allocation7]  }
  0x37   : > { %s1873_s21 = scalar_lea.hbm %s2596_s7, 16 }
  0x38   : > { %p1874_p13 = scmp.ne.s32.totalorder %s2596_s7, %s1873_s21  ;;  %p1880_p5 = scmp.lt.u32.totalorder %s1873_s21, %s2596_s7 }
  0x3a   : > { %p1876_p1 = pnand %p1874_p13, %p2264_p0 }
  0x3c   : > { %p1877_p6 = pneg %p1876_p1 }
  0x3e   : > { %p1882_p9 = pnand %p1880_p5, %p1877_p6 }
  0x40   : > { %1885 = shalt.err (!%p1882_p9)
}
  0x41   : > { %s1886_s27 = scalar_lea.vmem %s2252_s18, 16  ;;  %s1893_s14 = scalar_lea.vmem %s2252_s18, 32 }
  0x42   : > { %p1887_p10 = scmp.ne.s32.totalorder %s2252_s18, %s1886_s27  ;;  %p1894_p4 = scmp.lt.s32.totalorder %s2252_s18, %s2252_s18 }
  0x43   : > { %p1895_p7 = scmp.lt.s32.totalorder %s1893_s14, %s1886_s27 }
  0x44   : > { %p1889_p2 = pnand %p1887_p10, %p2264_p0 }
  0x45   : > { %p1896_p8 = por %p1895_p7, %p1894_p4 }
  0x46   : > { %p1890_p3 = pneg %p1889_p2 }
  0x48   : > { %p1897_p11 = pnand %p1896_p8, %p1890_p3 }
  0x4a   : > { %1900 = shalt.err (!%p1897_p11)
}
  0x4b   : > { %1737 = dma.hbm_to_vmem [thread:$0]  (!%p2248_p12), %s2596_s7, 16, %s2252_s18, [#allocation10]  }
  0x4c   : > { %s1901_s26 = scalar_lea.hbm %s2591_s2, 16 }
  0x4d   : > { %p1902_p13 = scmp.ne.s32.totalorder %s2591_s2, %s1901_s26  ;;  %p1908_p5 = scmp.lt.u32.totalorder %s1901_s26, %s2591_s2 }
  0x4f   : > { %p1904_p1 = pnand %p1902_p13, %p2264_p0 }
  0x51   : > { %p1905_p6 = pneg %p1904_p1 }
  0x53   : > { %p1910_p9 = pnand %p1908_p5, %p1905_p6 }
  0x55   : > { %1913 = shalt.err (!%p1910_p9)
}
  0x56   : > { %s1914_s18 = scalar_lea.vmem %s2254_s22, 16  ;;  %s1921_s14 = scalar_lea.vmem %s2254_s22, 32 }
  0x57   : > { %p1915_p10 = scmp.ne.s32.totalorder %s2254_s22, %s1914_s18  ;;  %p1922_p4 = scmp.lt.s32.totalorder %s2254_s22, %s2254_s22 }
  0x58   : > { %p1923_p7 = scmp.lt.s32.totalorder %s1921_s14, %s1914_s18 }
  0x59   : > { %p1917_p2 = pnand %p1915_p10, %p2264_p0 }
  0x5a   : > { %p1924_p8 = por %p1923_p7, %p1922_p4 }
  0x5b   : > { %p1918_p3 = pneg %p1917_p2 }
  0x5d   : > { %p1925_p11 = pnand %p1924_p8, %p1918_p3 }
  0x5f   : > { %1928 = shalt.err (!%p1925_p11)
}
  0x60   : > { %1728 = dma.hbm_to_vmem [thread:$0]  (!%p2248_p12), %s2591_s2, 16, %s2254_s22, [#allocation4]  }
  0x61   : > { %s2096_s24 = smov [#allocation8]   ;;  %s2097_s26 = smov [#allocation11]  }
  0x62   : > { %s404_s16 = sshll.u32 %s2096_s24, 4  ;;  %s429_s21 = sshll.u32 %s2097_s26, 4  ;;  %s405_s16 = int_to_ptr.vmem [resolvable:$true] %s404_s16  ;;  %s430_s21 = int_to_ptr.vmem [resolvable:$true] %s429_s21 }
  0x63   : > { %s1929_s27 = scalar_lea.hbm %s2594_s5, 16 }
  0x64   : > { %p1930_p13 = scmp.ne.s32.totalorder %s2594_s5, %s1929_s27  ;;  %p1936_p5 = scmp.lt.u32.totalorder %s1929_s27, %s2594_s5 }
  0x66   : > { %p1932_p1 = pnand %p1930_p13, %p2264_p0 }
  0x68   : > { %p1933_p6 = pneg %p1932_p1 }
  0x6a   : > { %p1938_p9 = pnand %p1936_p5, %p1933_p6 }
  0x6c   : > { %1941 = shalt.err (!%p1938_p9)
}
  0x6d   : > { %s1942_s22 = scalar_lea.vmem %s405_s16, 16  ;;  %s1949_s19 = scalar_lea.vmem %s405_s16, 32 }
  0x6e   : > { %p1943_p10 = scmp.ne.s32.totalorder %s405_s16, %s1942_s22  ;;  %p1950_p4 = scmp.lt.s32.totalorder %s405_s16, %s405_s16 }
  0x6f   : > { %p1951_p7 = scmp.lt.s32.totalorder %s1949_s19, %s1942_s22 }
  0x70   : > { %p1945_p2 = pnand %p1943_p10, %p2264_p0 }
  0x71   : > { %p1952_p8 = por %p1951_p7, %p1950_p4 }
  0x72   : > { %p1946_p3 = pneg %p1945_p2 }
  0x74   : > { %p1953_p11 = pnand %p1952_p8, %p1946_p3 }
  0x76   : > { %1956 = shalt.err (!%p1953_p11)
}
  0x77   : > { %1734 = dma.hbm_to_vmem [thread:$0]  (!%p2248_p12), %s2594_s5, 16, %s405_s16, [#allocation7]  }
  0x78   : > { %s1957_s29 = scalar_lea.hbm %s2597_s8, 16 }
  0x79   : > { %p1958_p13 = scmp.ne.s32.totalorder %s2597_s8, %s1957_s29  ;;  %p1964_p5 = scmp.lt.u32.totalorder %s1957_s29, %s2597_s8 }
  0x7b   : > { %p1960_p1 = pnand %p1958_p13, %p2264_p0 }
  0x7d   : > { %p1961_p6 = pneg %p1960_p1 }
  0x7f   : > { %p1966_p9 = pnand %p1964_p5, %p1961_p6 }
  0x81   : > { %1969 = shalt.err (!%p1966_p9)
}
  0x82   : > { %s1970_s22 = scalar_lea.vmem %s430_s21, 16  ;;  %s1977_s16 = scalar_lea.vmem %s430_s21, 32 }
  0x83   : > { %p1971_p10 = scmp.ne.s32.totalorder %s430_s21, %s1970_s22  ;;  %p1978_p4 = scmp.lt.s32.totalorder %s430_s21, %s430_s21 }
  0x84   : > { %p1979_p7 = scmp.lt.s32.totalorder %s1977_s16, %s1970_s22 }
  0x85   : > { %p1973_p2 = pnand %p1971_p10, %p2264_p0 }
  0x86   : > { %p1980_p8 = por %p1979_p7, %p1978_p4 }
  0x87   : > { %p1974_p3 = pneg %p1973_p2 }
  0x89   : > { %p1981_p11 = pnand %p1980_p8, %p1974_p3 }
  0x8b   : > { %1984 = shalt.err (!%p1981_p11)
}
  0x8c   : > { %1740 = dma.hbm_to_vmem [thread:$0]  (!%p2248_p12), %s2597_s8, 16, %s430_s21, [#allocation10]  }
  0x8d   : > { %s2098_s26 = smov [#allocation12]   ;;  %s1985_s27 = scalar_lea.hbm %s2598_s9, 16 }
  0x8e   : > { %s440_s3 = sshll.u32 %s2098_s26, 4  ;;  %p1986_p13 = scmp.ne.s32.totalorder %s2598_s9, %s1985_s27  ;;  %s441_s3 = int_to_ptr.vmem [resolvable:$true] %s440_s3 }
  0x8f   : > { %p1992_p5 = scmp.lt.u32.totalorder %s1985_s27, %s2598_s9 }
  0x90   : > { %p1988_p1 = pnand %p1986_p13, %p2264_p0 }
  0x92   : > { %p1989_p6 = pneg %p1988_p1 }
  0x94   : > { %p1994_p9 = pnand %p1992_p5, %p1989_p6 }
  0x96   : > { %1997 = shalt.err (!%p1994_p9)
}
  0x97   : > { %s1998_s21 = scalar_lea.vmem %s441_s3, 16  ;;  %s2005_s16 = scalar_lea.vmem %s441_s3, 32 }
  0x98   : > { %p1999_p10 = scmp.ne.s32.totalorder %s441_s3, %s1998_s21  ;;  %p2006_p4 = scmp.lt.s32.totalorder %s441_s3, %s441_s3 }
  0x99   : > { %p2007_p7 = scmp.lt.s32.totalorder %s2005_s16, %s1998_s21 }
  0x9a   : > { %p2001_p2 = pnand %p1999_p10, %p2264_p0 }
  0x9b   : > { %p2008_p8 = por %p2007_p7, %p2006_p4 }
  0x9c   : > { %p2002_p3 = pneg %p2001_p2 }
  0x9e   : > { %p2009_p11 = pnand %p2008_p8, %p2002_p3 }
  0xa0   : > { %2012 = shalt.err (!%p2009_p11)
}
  0xa1   : > { %1743 = dma.hbm_to_vmem [thread:$0]  (!%p2248_p12), %s2598_s9, 16, %s441_s3, [#allocation13]  }
  0xa2   : > { %p2631_p13 = scmp.ne.s32.totalorder %s2627_s25, 0 }
  0xa3   : > { %p2632_p1 = scmp.eq.s32.totalorder (!%p2631_p13), %s2212_s17, 0 }
  0xa4   : > { %478 = sbr.rel (%p2631_p13) target bundleno = 2750 (0xabe), region = 76 }
  0xab   : > { %2058 = dma.done.wait (%p2632_p1), [#allocation4], 16   ;;  %p2633_p0 = pmov %p2632_p1 }
  0xad   : > { %2060 = vsyncadd (%p2633_p0), [#allocation4], 4294967280  ;;  %p2634_p6 = pmov %p2633_p0 }
  0xae   : > { %p2635_p5 = pmov %p2633_p0 }
  0xaf   : > { %2062 = dma.done.wait (%p2634_p6), [#allocation7], 32  }
  0xb0   : > { %2064 = vsyncadd (%p2635_p5), [#allocation7], 4294967264  ;;  %p2636_p9 = pmov %p2633_p0 }
  0xb1   : > { %p2637_p12 = pmov %p2633_p0 }
  0xb2   : > { %2066 = dma.done.wait (%p2636_p9), [#allocation10], 32  }
  0xb3   : > { %2068 = vsyncadd (%p2637_p12), [#allocation10], 4294967264  ;;  %p2638_p10 = pmov %p2633_p0 }
  0xb4   : > { %p2639_p2 = pmov %p2633_p0 }
  0xb5   : > { %2070 = dma.done.wait (%p2638_p10), [#allocation13], 16  }
  0xb6   : > { %2072 = vsyncadd (%p2639_p2), [#allocation13], 4294967280  ;;  %p546_p3 = scmp.lt.s32.totalorder %s2212_s17, 1  ;;  %vm557_vm0 = vcmask 261120   ;;  %v1815_v7 = vld [vmem:[%s2593_s4] sm:$0xff]   ;;  %v2099_v8 = vmov 0.0   ;;  %v658_v38 = vlaneseq }
  0xb7   : > { %1615 = vmatprep.subr.bf16.mxu0 %v2099_v8  ;;  %vm2100_vm1 = vmmov 0   ;;  %v1816_v9 = vld [vmem:[%s2593_s4 + $0x8] sm:$0xff]   ;;  %1623 = vmatprep.subr.bf16.mxu1 %v2099_v8  ;;  %v1545_v14 = vld [vmem:[#allocation3] ss:$0 sm:$0xff]  ;;  %v1546_v16 = vld [vmem:[#allocation6] ss:$0 sm:$0xff] }
  0xb8   : > { %s2402_s25 = scalar_select %p546_p3, %s2212_s17, 1  ;;  %1619 = vmatprep.mubr.msk.bf16.mxu0 %vm2100_vm1, %v2099_v8  ;;  %1616 = vmatpush3.bf16.msra.mxu0 %v1815_v7  ;;  %v1547_v20 = vld [vmem:[#allocation8] ss:$0 sm:$0xff]  ;;  %vm666_vm2 = vcmask 64512   ;;  %v659_v40 = vshrl.u32 %v658_v38, 7  ;;  %vm730_vm4 = vcmask 1043456  }
  0xb9   : > { %1617 = vmatprep.subr.bf16.mxu0 %v2099_v8  ;;  %1625 = vmatprep.mubr.msk.bf16.mxu1 %vm2100_vm1, %v2099_v8  ;;  %s2101_s14 = smov 120   ;;  %s2102_s23 = smov 96   ;;  %vm775_vm5 = vcmask 60416   ;;  %vm894_vm6 = vcmask 126016   ;;  %vm1013_vm7 = vcmask 191616   ;;  %vm1132_vm8 = vcmask 257216  }
  0xba   : > { %s1544_s20 = sshll.u32 %s2402_s25, 3  ;;  %s2103_s22 = smov 88   ;;  %v660_v41 = vsub.s32 0, %v659_v40  ;;  %vm1339_vm9 = vcmask 523264  }
  0xbb   : > { %s549_s3 = scalar_lea.vmem %s2589_s0, %s1544_s20  ;;  %s2104_s21 = smov 80  }
  0xbc   : > { %v2408_v0 = vld [vmem:[%s549_s3] sm:$0xff]  ;;  %1618 = vmatpush3.bf16.msra.mxu0 %v1816_v9  ;;  %s2105_s16 = smov 112   ;;  %s2106_s19 = smov 72  }
  0xbd   : > { %v558_v1 = vsel %vm557_vm0, %v2408_v0, 0.0  ;;  %1629 = vmatprep.subr.bf16.mxu0 %v2099_v8  ;;  %s2107_s24 = smov 104   ;;  %s552_s26 = scalar_lea.vmem %s2590_s1, %s2402_s25 }
  0xbe   : > { %559 = vadd.xlane.f32.xlu0 %v558_v1  ;;  %v654_v39 = vld [vmem:[%s552_s26] sm:$0x1]  ;;  %s2108_s25 = smov 64   ;;  %s2109_s3 = smov 56  }
  0xbf   : > { %vm655_vm3 = vcmp.eq.f32.partialorder %v654_v39, 0.0  ;;  %s2110_s15 = smov 48   ;;  %s2111_s29 = smov 40  }
  0xc0   : > { %v656_v42 = vsel %vm655_vm3, -1e+09, %v2099_v8  ;;  %s2112_s27 = smov 8   ;;  %s2640_s20 = sld [smem:[#allocation25_spill]] }
  0xc1   : > { %v661_v43 = vrot.slane %v656_v42, %v660_v41  ;;  %s1579_s28 = sshll.u32 %s2212_s17, 7 }
  0xc6   : > { %p2643_p7 = scmp.ne.s32.totalorder %s2640_s20, 0 }
 0x14b   : > { %v560_v2 = vpop.xlane.xlu0 %559 }
 0x14c   : > { %v562_v3 = vmul.f32 0.03125, %v560_v2 }
 0x14e   : > { %v563_v4 = vsub.f32 %v2408_v0, %v562_v3 }
 0x150   : > { %v564_v5 = vmul.f32 %v563_v4, %v563_v4 }
 0x152   : > { %v565_v6 = vsel %vm557_vm0, %v564_v5, 0.0 }
 0x153   : > { %566 = vadd.xlane.f32.xlu0 %v565_v6 }
 0x1e0   : > { %v567_v10 = vpop.xlane.xlu0 %566 }
 0x1e1   : > { %v568_v11 = vmul.f32 0.03125, %v567_v10 }
 0x1e3   : > { %v569_v12 = vadd.f32 1e-05, %v568_v11 }
 0x1e5   : > { %1825 = vrsqrt.f32 %v569_v12 }
 0x1ef   : > { %v1826_v13 = vpop.eup %1825 }
 0x1f0   : > { %v571_v15 = vmul.f32 %v1826_v13, %v563_v4 }
 0x1f2   : > { %v578_v17 = vmul.f32 %v1545_v14, %v571_v15 }
 0x1f4   : > { %v585_v18 = vadd.f32 %v1546_v16, %v578_v17 }
 0x1f6   : > { %v586_v19 = vpack.c.bf16 %v585_v18, %v585_v18 }
 0x1f8   : > { %1620 = vmatmul.mubr.msk.bf16.vlgmr.msra.gmra.mrb[0].mxu0 %vm557_vm0, %v586_v19 }
 0x1f9   : > { %1631 = vmatprep.mubr.msk.bf16.mxu0 %vm2100_vm1, %v2099_v8 }
 0x2cb   : > { %v647_v21 = vpop.f32.mrb[0].mxu0 }
 0x2cc   : > { %v648_v22 = vadd.f32 %v1547_v20, %v647_v21  ;;  %v1621_v23 = vpop.f32.mrb[1].mxu0 }
 0x2cd   : > { %v650_v24 = vpop.f32.mrb[2].mxu0 }
 0x2ce   : > { %v2431_v25 = vpack.c.bf16 %v648_v22, %v648_v22  ;;  %v1622_v26 = vpop.f32.mrb[3].mxu0 }
 0x2d0   : > { %777 = vrot.lane.b32.xlu0 %v2431_v25, %s2101_s14  ;;  %664 = vrot.lane.b32.xlu1 %v2431_v25, %s2102_s23  ;;  %s2115_s23 = smov [#allocation14]  }
 0x2d4   : > { %779 = vrot.lane.b32.xlu1 %v2431_v25, %s2103_s22  ;;  %s2017_s22 = sshll.u32 %s2115_s23, 4  ;;  %s2018_s22 = int_to_ptr.vmem [resolvable:$false] %s2017_s22 }
 0x2d8   : > { %898 = vrot.lane.b32.xlu1 %v2431_v25, %s2104_s21  ;;  %s2113_s21 = smov 16  }
 0x2dc   : > { %896 = vrot.lane.b32.xlu1 %v2431_v25, %s2105_s16  ;;  %s2114_s16 = smov 24  }
 0x2e0   : > { %1017 = vrot.lane.b32.xlu1 %v2431_v25, %s2106_s19 }
 0x2e4   : > { %1015 = vrot.lane.b32.xlu1 %v2431_v25, %s2107_s24 }
 0x342   : > { %v665_v27 = vpop.permute.xlu1 %664  ;;  %v778_v32 = vpop.permute.xlu0 %777 }
 0x343   : > { %v671_v28 = vsel %vm666_vm2, %v665_v27, 0 }
 0x344   : > { %1624 = vmatpush3.bf16.xpose.msra.mxu1 %v671_v28 }
 0x345   : > { %1635 = vmatprep.subr.bf16.mxu1 %v2099_v8 }
 0x346   : > { %v780_v29 = vpop.permute.xlu1 %779 }
 0x347   : > { %v785_v30 = vsel %vm666_vm2, %v780_v29, 0 }
 0x34a   : > { %v899_v31 = vpop.permute.xlu1 %898 }
 0x34b   : > { %1626 = vmatmul.mubr.msk.bf16.vlgmr.msra.gmra.mrb[0].mxu1 %vm666_vm2, %v2431_v25  ;;  %v904_v34 = vsel %vm666_vm2, %v899_v31, 0 }
 0x34c   : > { %1636 = vmatpush3.bf16.xpose.msra.mxu1 %v785_v30  ;;  %1637 = vmatprep.mubr.msk.bf16.mxu1 %vm2100_vm1, %v2099_v8 }
 0x34d   : > { %1647 = vmatprep.subr.bf16.mxu1 %v2099_v8 }
 0x34e   : > { %v897_v33 = vpop.permute.xlu1 %896 }
 0x352   : > { %v1018_v35 = vpop.permute.xlu1 %1017 }
 0x353   : > { %1638 = vmatmul.mubr.msk.bf16.vlgmr.msra.gmra.mrb[4].mxu1 %vm666_vm2, %v778_v32  ;;  %v1023_v36 = vsel %vm666_vm2, %v1018_v35, 0 }
 0x354   : > { %1648 = vmatpush3.bf16.xpose.msra.mxu1 %v904_v34  ;;  %1649 = vmatprep.mubr.msk.bf16.mxu1 %vm2100_vm1, %v2099_v8 }
 0x355   : > { %1659 = vmatprep.subr.bf16.mxu1 %v2099_v8 }
 0x356   : > { %v1016_v37 = vpop.permute.xlu1 %1015 }
 0x35b   : > { %1650 = vmatmul.mubr.msk.bf16.vlgmr.msra.gmra.mrb[8].mxu1 %vm666_vm2, %v897_v33 }
 0x35c   : > { %1660 = vmatpush3.bf16.xpose.msra.mxu1 %v1023_v36  ;;  %1661 = vmatprep.mubr.msk.bf16.mxu1 %vm2100_vm1, %v2099_v8 }
 0x35d   : > { %1671 = vmatprep.subr.bf16.mxu1 %v2099_v8 }
 0x363   : > { %1662 = vmatmul.mubr.msk.bf16.vlgmr.msra.gmra.mrb[12].mxu1 %vm666_vm2, %v1016_v37 }
 0x364   : > { %1675 = vmatprep.mubr.msk.bf16.mxu1 %vm2100_vm1, %v2099_v8 }
 0x41e   : > { %v707_v44 = vpop.f32.mrb[0].mxu1 }
 0x41f   : > { %v708_v45 = vadd.f32 %v707_v44, %v661_v43  ;;  %v1627_v46 = vpop.f32.mrb[1].mxu1 }
 0x420   : > { %v710_v47 = vpop.f32.mrb[2].mxu1 }
 0x421   : > { %v1628_v48 = vpop.f32.mrb[3].mxu1  ;;  %v713_v49 = vsel %vm666_vm2, %v708_v45, -inf }
 0x422   : > { %714 = vmax.xlane.f32.xlu1 %v713_v49 }
 0x426   : > { %v821_v50 = vpop.f32.mrb[4].mxu1 }
 0x427   : > { %v822_v51 = vadd.f32 %v821_v50, %v661_v43  ;;  %v1639_v52 = vpop.f32.mrb[5].mxu1 }
 0x428   : > { %v824_v53 = vpop.f32.mrb[6].mxu1 }
 0x429   : > { %v1640_v54 = vpop.f32.mrb[7].mxu1  ;;  %v827_v55 = vsel %vm666_vm2, %v822_v51, -inf }
 0x42a   : > { %828 = vmax.xlane.f32.xlu0 %v827_v55 }
 0x42e   : > { %v940_v56 = vpop.f32.mrb[8].mxu1 }
 0x42f   : > { %v941_v57 = vadd.f32 %v940_v56, %v661_v43  ;;  %v1651_v58 = vpop.f32.mrb[9].mxu1 }
 0x430   : > { %v943_v59 = vpop.f32.mrb[10].mxu1 }
 0x431   : > { %v1652_v60 = vpop.f32.mrb[11].mxu1  ;;  %v946_v61 = vsel %vm666_vm2, %v941_v57, -inf }
 0x432   : > { %947 = vmax.xlane.f32.xlu1 %v946_v61  ;;  %v1817_v60 = vld [vmem:[%s2595_s6] sm:$0xff]  }
 0x433   : > { %1672 = vmatpush3.bf16.msra.mxu1 %v1817_v60 }
 0x434   : > { %1673 = vmatprep.subr.bf16.mxu1 %v2099_v8 }
 0x436   : > { %v1059_v62 = vpop.f32.mrb[12].mxu1 }
 0x437   : > { %v1060_v63 = vadd.f32 %v1059_v62, %v661_v43  ;;  %v1663_v1 = vpop.f32.mrb[13].mxu1  ;;  %v1818_v62 = vld [vmem:[%s2595_s6 + $0x8] sm:$0xff]  }
 0x438   : > { %v1062_v2 = vpop.f32.mrb[14].mxu1  ;;  %1674 = vmatpush3.bf16.msra.mxu1 %v1818_v62 }
 0x439   : > { %v1664_v3 = vpop.f32.mrb[15].mxu1  ;;  %v1065_v4 = vsel %vm666_vm2, %v1060_v63, -inf  ;;  %1687 = vmatprep.subr.bf16.mxu1 %v2099_v8 }
 0x43a   : > { %1066 = vmax.xlane.f32.xlu0 %v1065_v4 }
 0x4af   : > { %v715_v5 = vpop.xlane.xlu1 %714 }
 0x4b0   : > { %v716_v6 = vsub.f32 %v708_v45, %v715_v5 }
 0x4b2   : > { %v717_v7 = vmul.f32 1.442695, %v716_v6 }
 0x4b4   : > { %1827 = vpow2.f32 %v717_v7 }
 0x4b7   : > { %v829_v9 = vpop.xlane.xlu0 %828 }
 0x4b8   : > { %v830_v10 = vsub.f32 %v822_v51, %v829_v9 }
 0x4ba   : > { %v831_v11 = vmul.f32 1.442695, %v830_v10 }
 0x4bc   : > { %1829 = vpow2.f32 %v831_v11 }
 0x4be   : > { %v1828_v12 = vpop.eup %1827 }
 0x4bf   : > { %v719_v13 = vsel %vm666_vm2, %v1828_v12, 0.0  ;;  %v948_v21 = vpop.xlane.xlu1 %947 }
 0x4c0   : > { %720 = vadd.xlane.f32.xlu1 %v719_v13  ;;  %v949_v22 = vsub.f32 %v941_v57, %v948_v21 }
 0x4c2   : > { %v950_v23 = vmul.f32 1.442695, %v949_v22 }
 0x4c6   : > { %v1830_v14 = vpop.eup %1829 }
 0x4c7   : > { %v1067_v15 = vpop.xlane.xlu0 %1066  ;;  %v833_v16 = vsel %vm666_vm2, %v1830_v14, 0.0 }
 0x4c8   : > { %v1068_v17 = vsub.f32 %v1060_v63, %v1067_v15  ;;  %834 = vadd.xlane.f32.xlu0 %v833_v16 }
 0x4ca   : > { %v1069_v18 = vmul.f32 1.442695, %v1068_v17 }
 0x4cc   : > { %1831 = vpow2.f32 %v1069_v18 }
 0x4cd   : > { %1833 = vpow2.f32 %v950_v23 }
 0x4d1   : > { %725 = vrot.lane.b32.xlu1 %v2431_v25, %s2108_s25 }
 0x4d6   : > { %v1832_v19 = vpop.eup %1831 }
 0x4d7   : > { %v1071_v20 = vsel %vm666_vm2, %v1832_v19, 0.0  ;;  %v1834_v24 = vpop.eup %1833 }
 0x4d8   : > { %1072 = vadd.xlane.f32.xlu0 %v1071_v20  ;;  %v952_v26 = vsel %vm666_vm2, %v1834_v24, 0.0 }
 0x4ee   : > { %839 = vrot.lane.b32.xlu0 %v2431_v25, %s2109_s3 }
 0x4f5   : > { %953 = vadd.xlane.f32.xlu1 %v952_v26 }
 0x506   : > { %958 = vrot.lane.b32.xlu1 %v2431_v25, %s2110_s15 }
 0x50a   : > { %1077 = vrot.lane.b32.xlu1 %v2431_v25, %s2111_s29  ;;  %s2641_s29 = sld [smem:[#allocation28_spill]] }
 0x510   : > { %s2546_s18 = scalar_lea.hbm %s2641_s29, %s1579_s28 }
 0x54d   : > { %v721_v27 = vpop.xlane.xlu1 %720 }
 0x54e   : > { %1835 = vrcp.f32 %v721_v27 }
 0x551   : > { %v726_v28 = vpop.permute.xlu1 %725 }
 0x552   : > { %v732_v29 = vsel %vm730_vm4, %v726_v28, 0  ;;  %v1819_v28 = vld [vmem:[%s2599_s10] sm:$0xff]  }
 0x553   : > { %1630 = vmatpush3.bf16.msra.mxu0 %v732_v29  ;;  %v1821_v29 = vld [vmem:[%s2601_s12] sm:$0xff]  }
 0x554   : > { %1641 = vmatprep.subr.bf16.mxu0 %v2099_v8 }
 0x555   : > { %v835_v31 = vpop.xlane.xlu0 %834 }
 0x556   : > { %1837 = vrcp.f32 %v835_v31 }
 0x558   : > { %v1836_v30 = vpop.eup %1835 }
 0x559   : > { %v723_v32 = vmul.f32 %v1836_v30, %v1828_v12  ;;  %v1822_v30 = vld [vmem:[%s2601_s12 + $0x8] sm:$0xff]  }
 0x55b   : > { %v724_v33 = vpack.c.bf16 %v723_v32, %v723_v32 }
 0x55d   : > { %1632 = vmatmul.mubr.msk.bf16.vlgmr.msra.gmra.mrb[4].mxu0 %vm666_vm2, %v724_v33 }
 0x55e   : > { %1643 = vmatprep.mubr.msk.bf16.mxu0 %vm2100_vm1, %v2099_v8 }
 0x560   : > { %v1838_v25 = vpop.eup %1837 }
 0x561   : > { %v837_v35 = vmul.f32 %v1838_v25, %v1830_v14  ;;  %v1562_v14 = vld [vmem:[#allocation9] ss:$0 sm:$0xff] }
 0x563   : > { %v838_v38 = vpack.c.bf16 %v837_v35, %v837_v35 }
 0x565   : > { %v1073_v34 = vpop.xlane.xlu0 %1072 }
 0x569   : > { %v840_v36 = vpop.permute.xlu0 %839 }
 0x56a   : > { %v845_v37 = vsel %vm730_vm4, %v840_v36, 0  ;;  %v1567_v36 = vld [vmem:[#allocation12] ss:$0 sm:$0xff] }
 0x56b   : > { %1642 = vmatpush3.bf16.msra.mxu0 %v845_v37 }
 0x56c   : > { %1653 = vmatprep.subr.bf16.mxu0 %v2099_v8 }
 0x56e   : > { %1644 = vmatmul.mubr.msk.bf16.vlgmr.msra.gmra.mrb[8].mxu0 %vm666_vm2, %v838_v38 }
 0x56f   : > { %1655 = vmatprep.mubr.msk.bf16.mxu0 %vm2100_vm1, %v2099_v8 }
 0x582   : > { %v954_v39 = vpop.xlane.xlu1 %953 }
 0x583   : > { %1839 = vrcp.f32 %v954_v39 }
 0x584   : > { %1841 = vrcp.f32 %v1073_v34  ;;  %v1566_v34 = vld [vmem:[#allocation11] ss:$0 sm:$0xff] }
 0x586   : > { %v959_v40 = vpop.permute.xlu1 %958 }
 0x587   : > { %v964_v41 = vsel %vm730_vm4, %v959_v40, 0  ;;  %v1823_v40 = vld [vmem:[%s2601_s12 + $0x10] sm:$0xff]  }
 0x588   : > { %1654 = vmatpush3.bf16.msra.mxu0 %v964_v41  ;;  %v1824_v41 = vld [vmem:[%s2601_s12 + $0x18] sm:$0xff]  }
 0x589   : > { %1665 = vmatprep.subr.bf16.mxu0 %v2099_v8 }
 0x58a   : > { %v1078_v44 = vpop.permute.xlu1 %1077 }
 0x58b   : > { %v1083_v47 = vsel %vm730_vm4, %v1078_v44, 0 }
 0x58d   : > { %v1840_v42 = vpop.eup %1839 }
 0x58e   : > { %v956_v43 = vmul.f32 %v1840_v42, %v1834_v24  ;;  %v1842_v46 = vpop.eup %1841  ;;  %v1568_v42 = vld [vmem:[%s2600_s11] ss:$0 sm:$0xff] }
 0x58f   : > { %v1075_v48 = vmul.f32 %v1842_v46, %v1832_v19 }
 0x590   : > { %v957_v45 = vpack.c.bf16 %v956_v43, %v956_v43 }
 0x591   : > { %v1076_v49 = vpack.c.bf16 %v1075_v48, %v1075_v48 }
 0x592   : > { %1656 = vmatmul.mubr.msk.bf16.vlgmr.msra.gmra.mrb[12].mxu0 %vm666_vm2, %v957_v45 }
 0x593   : > { %1666 = vmatpush3.bf16.msra.mxu0 %v1083_v47  ;;  %1667 = vmatprep.mubr.msk.bf16.mxu0 %vm2100_vm1, %v2099_v8 }
 0x594   : > { %1679 = vmatprep.subr.bf16.mxu0 %v2099_v8 }
 0x59a   : > { %1668 = vmatmul.mubr.msk.bf16.vlgmr.msra.gmra.mrb[16].mxu0 %vm666_vm2, %v1076_v49 }
 0x59b   : > { %1683 = vmatprep.mubr.msk.bf16.mxu0 %vm2100_vm1, %v2099_v8  ;;  %1680 = vmatpush3.bf16.msra.mxu0 %v1819_v28 }
 0x59c   : > { %1681 = vmatprep.subr.bf16.mxu0 %v2099_v8 }
 0x630   : > { %v768_v50 = vpop.f32.mrb[4].mxu0 }
 0x631   : > { %v774_v51 = vpack.c.bf16 %v768_v50, %v768_v50  ;;  %v1633_v52 = vpop.f32.mrb[5].mxu0 }
 0x632   : > { %v771_v53 = vpop.f32.mrb[6].mxu0 }
 0x633   : > { %776 = vst.msk [vmem:[#allocation2] sm:$0xf] %vm775_vm5, %v774_v51  ;;  %v1634_v54 = vpop.f32.mrb[7].mxu0 }
 0x641   : > { %v881_v55 = vpop.f32.mrb[8].mxu0 }
 0x642   : > { %v1582_v56 = vpack.c.bf16 %v881_v55, %v881_v55  ;;  %v1645_v57 = vpop.f32.mrb[9].mxu0 }
 0x643   : > { %v884_v58 = vpop.f32.mrb[10].mxu0 }
 0x644   : > { %891 = vrot.lane.b32.xlu0 %v1582_v56, %s2112_s27  ;;  %v1646_v59 = vpop.f32.mrb[11].mxu0  ;;  %s2642_s27 = smov %s2641_s29 }
 0x665   : > { %v1000_v61 = vpop.f32.mrb[12].mxu0 }
 0x666   : > { %v1583_v63 = vpack.c.bf16 %v1000_v61, %v1000_v61  ;;  %v1657_v1 = vpop.f32.mrb[13].mxu0 }
 0x667   : > { %v1003_v2 = vpop.f32.mrb[14].mxu0 }
 0x668   : > { %1010 = vrot.lane.b32.xlu1 %v1583_v63, %s2113_s21  ;;  %v1658_v3 = vpop.f32.mrb[15].mxu0  ;;  %s543_s21 = sand.u32 1, %s2083_s30  }
 0x669   : > { %s1386_s17 = scalar_lea.sflag [#allocation5], %s543_s21 }
 0x66d   : > { %v1119_v4 = vpop.f32.mrb[16].mxu0 }
 0x66e   : > { %v1584_v5 = vpack.c.bf16 %v1119_v4, %v1119_v4  ;;  %v1669_v6 = vpop.f32.mrb[17].mxu0 }
 0x66f   : > { %v1122_v7 = vpop.f32.mrb[18].mxu0 }
 0x670   : > { %1129 = vrot.lane.b32.xlu0 %v1584_v5, %s2114_s16  ;;  %v1670_v9 = vpop.f32.mrb[19].mxu0  ;;  %s1543_s16 = sshll.u32 %s543_s21, 3 }
 0x671   : > { %s545_s26 = scalar_lea.vmem [#allocation14], %s1543_s16  ;;  %s2019_s16 = scalar_lea.vmem %s2018_s22, 256 }
 0x672   : > { %s1399_s25 = sshll.u32 %s545_s26, 4  ;;  %s2548_s25 = int_to_ptr.vmem [resolvable:$true] %s1399_s25 }
 0x673   : > { %s2013_s14 = scalar_lea.vmem %s2548_s25, 128  ;;  %p2020_p13 = scmp.lt.s32.totalorder %s2548_s25, %s2018_s22 }
 0x674   : > { %p2014_p4 = scmp.ne.s32.totalorder %s2548_s25, %s2013_s14  ;;  %p2021_p1 = scmp.lt.s32.totalorder %s2019_s16, %s2013_s14 }
 0x676   : > { %p2015_p8 = pnand %p2014_p4, %p2643_p7  ;;  %p2022_p0 = por %p2021_p1, %p2020_p13 }
 0x678   : > { %p2016_p11 = pneg %p2015_p8 }
 0x67a   : > { %p2023_p6 = pnand %p2022_p0, %p2016_p11 }
 0x6b6   : > { %v892_v10 = vpop.permute.xlu0 %891 }
 0x6b7   : > { %895 = vst.msk [vmem:[#allocation2] sm:$0xf] %vm894_vm6, %v892_v10 }
 0x6da   : > { %v1011_v11 = vpop.permute.xlu1 %1010 }
 0x6db   : > { %1014 = vst.msk [vmem:[#allocation2] sm:$0xf] %vm1013_vm7, %v1011_v11 }
 0x6e2   : > { %v1130_v12 = vpop.permute.xlu0 %1129 }
 0x6e3   : > { %1133 = vst.msk [vmem:[#allocation2] sm:$0xf] %vm1132_vm8, %v1130_v12 }
 0x6ea   : > { %v1134_v13 = vld [vmem:[#allocation2] sm:$0xf] }
 0x6eb   : > { %1676 = vmatmul.mubr.msk.bf16.vlgmr.msra.gmra.mrb[16].mxu1 %vm557_vm0, %v1134_v13 }
 0x6ec   : > { %1695 = vmatprep.mubr.msk.bf16.mxu1 %vm2100_vm1, %v2099_v8  ;;  %1688 = vmatpush3.bf16.msra.mxu1 %v1821_v29 }
 0x6ed   : > { %1689 = vmatprep.subr.bf16.mxu1 %v2099_v8 }
 0x6f0   : > { %1690 = vmatpush3.bf16.msra.mxu1 %v1822_v30 }
 0x6f1   : > { %1691 = vmatprep.subr.bf16.mxu1 %v2099_v8 }
 0x6f4   : > { %1692 = vmatpush3.bf16.msra.mxu1 %v1823_v40 }
 0x6f5   : > { %1693 = vmatprep.subr.bf16.mxu1 %v2099_v8  ;;  %v1572_v8 = vld [vmem:[%s2602_s13] ss:$0 sm:$0xff] }
 0x6f8   : > { %1694 = vmatpush3.bf16.msra.mxu1 %v1824_v41 }
 0x7be   : > { %v1195_v15 = vpop.f32.mrb[16].mxu1 }
 0x7bf   : > { %v1196_v16 = vadd.f32 %v1562_v14, %v1195_v15  ;;  %v1677_v17 = vpop.f32.mrb[17].mxu1 }
 0x7c0   : > { %v1198_v18 = vpop.f32.mrb[18].mxu1 }
 0x7c1   : > { %v1201_v19 = vadd.f32 %v1196_v16, %v2408_v0  ;;  %v1678_v20 = vpop.f32.mrb[19].mxu1  ;;  %v1820_v0 = vld [vmem:[%s2599_s10 + $0x8] sm:$0xff]  }
 0x7c2   : > { %1682 = vmatpush3.bf16.msra.mxu0 %v1820_v0 }
 0x7c3   : > { %v1204_v21 = vsel %vm557_vm0, %v1201_v19, 0.0 }
 0x7c4   : > { %1205 = vadd.xlane.f32.xlu1 %v1204_v21 }
 0x851   : > { %v1206_v22 = vpop.xlane.xlu1 %1205 }
 0x852   : > { %v1207_v23 = vmul.f32 0.03125, %v1206_v22 }
 0x854   : > { %v1208_v24 = vsub.f32 %v1201_v19, %v1207_v23 }
 0x856   : > { %v1209_v26 = vmul.f32 %v1208_v24, %v1208_v24 }
 0x858   : > { %v1210_v27 = vsel %vm557_vm0, %v1209_v26, 0.0 }
 0x859   : > { %1211 = vadd.xlane.f32.xlu0 %v1210_v27 }
 0x8e6   : > { %v1212_v31 = vpop.xlane.xlu0 %1211 }
 0x8e7   : > { %v1213_v32 = vmul.f32 0.03125, %v1212_v31 }
 0x8e9   : > { %v1214_v33 = vadd.f32 1e-05, %v1213_v32 }
 0x8eb   : > { %1843 = vrsqrt.f32 %v1214_v33 }
 0x8f5   : > { %v1844_v25 = vpop.eup %1843 }
 0x8f6   : > { %v1216_v35 = vmul.f32 %v1844_v25, %v1208_v24 }
 0x8f8   : > { %v1223_v37 = vmul.f32 %v1566_v34, %v1216_v35 }
 0x8fa   : > { %v1230_v38 = vadd.f32 %v1567_v36, %v1223_v37 }
 0x8fc   : > { %v1231_v39 = vpack.c.bf16 %v1230_v38, %v1230_v38 }
 0x8fe   : > { %1684 = vmatmul.mubr.msk.bf16.vlgmr.msra.gmra.mrb[20].mxu0 %vm557_vm0, %v1231_v39 }
 0x9d1   : > { %v1292_v43 = vpop.f32.mrb[20].mxu0 }
 0x9d2   : > { %v1293_v44 = vadd.f32 %v1568_v42, %v1292_v43  ;;  %v1685_v45 = vpop.f32.mrb[21].mxu0 }
 0x9d3   : > { %v1295_v46 = vpop.f32.mrb[22].mxu0 }
 0x9d4   : > { %v1298_v47 = vmax.f32 %v1293_v44, 0.0  ;;  %v1686_v48 = vpop.f32.mrb[23].mxu0 }
 0x9d6   : > { %v1299_v49 = vpack.c.bf16 %v1298_v47, %v1298_v47 }
 0x9d8   : > { %1696 = vmatmul.mubr.msk.bf16.vlgmr.msra.gmra.mrb[20].mxu1 %vm1339_vm9, %v1299_v49 }
 0xaab   : > { %v1377_v50 = vpop.f32.mrb[20].mxu1 }
 0xaac   : > { %v1378_v51 = vadd.f32 %v1572_v8, %v1377_v50  ;;  %v1697_v52 = vpop.f32.mrb[21].mxu1 }
 0xaad   : > { %v1380_v53 = vpop.f32.mrb[22].mxu1 }
 0xaae   : > { %v1383_v54 = vadd.f32 %v1378_v51, %v1201_v19  ;;  %v1698_v55 = vpop.f32.mrb[23].mxu1 }
 0xab0   : > { %1384 = vst.msk [vmem:[%s545_s26] sm:$0xff] %vm557_vm0, %v1383_v54 }
 0xab1   : > { %2026 = shalt.err (!%p2023_p6)
}
 0xab2   : > { %s2027_s21 = scalar_lea.hbm %s2546_s18, 128  ;;  %s2031_s28 = scalar_lea.hbm %s2642_s27, 256 }
 0xab3   : > { %p2028_p5 = scmp.ne.s32.totalorder %s2546_s18, %s2027_s21  ;;  %p2032_p10 = scmp.lt.u32.totalorder %s2546_s18, %s2642_s27 }
 0xab4   : > { %p2033_p2 = scmp.lt.u32.totalorder %s2031_s28, %s2027_s21  ;;  %p2035_p4 = scmp.lt.u32.totalorder %s2027_s21, %s2546_s18 }
 0xab5   : > { %p2029_p9 = pnand %p2028_p5, %p2643_p7 }
 0xab6   : > { %p2034_p3 = por %p2033_p2, %p2032_p10 }
 0xab7   : > { %p2030_p12 = pneg %p2029_p9 }
 0xab8   : > { %p2036_p8 = por %p2035_p4, %p2034_p3 }
 0xaba   : > { %p2037_p11 = pnand %p2036_p8, %p2030_p12 }
 0xabc   : > { %2040 = shalt.err (!%p2037_p11)
}
 0xabd   : > { %1723 = dma.vmem_to_hbm [thread:$0]  (%p2643_p7), %s2548_s25, 128, %s2546_s18, %s1386_s17  }
 0xabe PF: > { %s2644_s15 = sld [smem:[#allocation22_spill]]  ;;  %s2645_s29 = sld [smem:[#allocation20_spill]] }
 0xabf   : > { %s2646_s14 = sld [smem:[#allocation26_spill]] }
 0xac4   : > { %p1760_p13 = scmp.ge.s32.totalorder %s2644_s15, 2  ;;  %s1411_s23 = sand.u32 1, %s2645_s29  }
 0xac5   : > { %p2647_p1 = scmp.ne.s32.totalorder %s2646_s14, 0  ;;  %s1412_s22 = scalar_lea.sflag [#allocation5], %s1411_s23 }
 0xac7   : > { %p1745_p0 = pnand %p1760_p13, %p2647_p1 }
 0xac9   : > { %2074 = dma.done.wait (!%p1745_p0), %s1412_s22, 128  }
 0xaca   : > { %2076 = vsyncadd (!%p1745_p0), %s1412_s22, 4294967168  ;;  %s2648_s16 = sld [smem:[#allocation23_spill]]  ;;  %s2649_s21 = sld [smem:[#allocation21_spill]] }
 0xacb   : > { %s2650_s15 = sld [smem:[#allocation24_spill]]  ;;  %s2651_s29 = smov %s2083_s30 }
 0xad0   : > { %p28_p6 = scmp.ge.s32.totalorder %s2648_s16, 4   ;;  %s2652_s30 = smov %s2649_s21 }
 0xad2   :  { %30 = sbr.rel (!%p28_p6) target bundleno = 10 (0xa), region = 139 }
 0xad9   :  { %1417 = vsyncpa [#allocation4], 1 }
 0xada   :  { %1419 = vsyncpa [#allocation4 + $0x1], 1 }
 0xadb   :  { %1420 = vsyncpa [#allocation7], 1 }
 0xadc   :  { %1421 = vsyncpa [#allocation10], 1 }
 0xadd   :  { %1422 = vsyncpa [#allocation13], 1 }
 0xade   :  { %1423 = vsyncpa [#allocation5], 1 }
 0xadf   :  { %1425 = vsyncpa [#allocation5 + $0x1], 1 }

</bundles_post_ra>
